<compile_context>
chip_gen: v7x
topology: tpu7x:2x2x1
jax: 0.10.0
libtpu: 0.0.40
codegen_flags: <defaults>
</compile_context>

<pallas_src>
import functools

import jax
import jax.numpy as jnp
import numpy as np
from jax.experimental import pallas as pl
from jax.experimental.pallas import tpu as pltpu


# ----------------------------- Fused Pallas kernel ------------------------- #

def fused_lm_kernel(*refs, hidden, num_layers, t_max, batch_pad):
    """Stacked LSTM over padded time-major input + fc1 + log_softmax.

    refs = [x, (w_ih, w_hh, b) * num_layers, fc_w, fc_b, out, h_hist_scratch]
      x        : (t_max * batch_pad, E)   padded, flattened time-major input
      w_ih     : (E_in, 4H), w_hh: (H, 4H), b: (1, 4H)   per layer
      fc_w     : (H, V), fc_b: (1, V)
      out      : (t_max * batch_pad, V)   log-probs for every padded slot
      h_hist   : (t_max * batch_pad, H)   VMEM scratch (hidden-state history)
    """
    x_ref = refs[0]
    lrefs = refs[1:1 + 3 * num_layers]
    fc_w_ref = refs[1 + 3 * num_layers]
    fc_b_ref = refs[2 + 3 * num_layers]
    o_ref = refs[3 + 3 * num_layers]
    h_hist_ref = refs[4 + 3 * num_layers]

    h2 = 2 * hidden
    h3 = 3 * hidden
    h4 = 4 * hidden

    x = x_ref[...]                                       # (T_max*Bp, E_in)
    for layer in range(num_layers):
        w_ih = lrefs[3 * layer][...]
        w_hh = lrefs[3 * layer + 1][...]
        b = lrefs[3 * layer + 2][...]

        # Hoisted, time-parallel input projection: one batched MXU matmul
        # (bias fused here so it is off the serial path entirely).
        xg = jnp.dot(x, w_ih, preferred_element_type=jnp.float32) + b  # (T*Bp, 4H)

        h = jnp.zeros((batch_pad, hidden), jnp.float32)
        c = jnp.zeros((batch_pad, hidden), jnp.float32)
        # Statically unrolled recurrence; only h @ W_hh is serial.
        for t in range(t_max):
            gates = xg[t * batch_pad:(t + 1) * batch_pad, :] + jnp.dot(
                h, w_hh, preferred_element_type=jnp.float32)           # (Bp, 4H)
            # Gate order i, f, g, o: one sigmoid pass covers i and f.
            i_f = jax.nn.sigmoid(gates[:, 0:h2])                        # (Bp, 2H)
            i = i_f[:, 0:hidden]
            f = i_f[:, hidden:h2]
            g = jnp.tanh(gates[:, h2:h3])
            o = jax.nn.sigmoid(gates[:, h3:h4])
            c = f * c + i * g
            h = o * jnp.tanh(c)
            h_hist_ref[t * batch_pad:(t + 1) * batch_pad, :] = h
        x = h_hist_ref[...]                              # next-layer input (T*Bp, H)

    # fc1 + log_softmax over all padded slots in one MXU matmul.
    # V = 128 -> lane-dense, unmasked stores.
    logits = jnp.dot(x, fc_w_ref[...], preferred_element_type=jnp.float32) + fc_b_ref[...]
    m = jnp.max(logits, axis=-1, keepdims=True)
    s = logits - m
    lse = jnp.log(jnp.sum(jnp.exp(s), axis=-1, keepdims=True))
    o_ref[...] = s - lse


def fused_lm_call(x_flat, lstm_params, fc_w, fc_b, *, hidden, t_max, batch_pad):
    num_layers = len(lstm_params)
    flat_w = []
    for (w_ih, w_hh, b) in lstm_params:
        flat_w += [w_ih, w_hh, b]
    n_rows = t_max * batch_pad
    vocab = fc_w.shape[1]
    n_in = 1 + 3 * num_layers + 2
    return pl.pallas_call(
        functools.partial(fused_lm_kernel, hidden=hidden, num_layers=num_layers,
                          t_max=t_max, batch_pad=batch_pad),
        in_specs=[pl.BlockSpec(memory_space=pltpu.MemorySpace.VMEM)] * n_in,
        out_specs=pl.BlockSpec(memory_space=pltpu.MemorySpace.VMEM),
        out_shape=jax.ShapeDtypeStruct((n_rows, vocab), jnp.float32),
        scratch_shapes=[pltpu.VMEM((n_rows, hidden), jnp.float32)],
    )(x_flat, *flat_w, fc_w, fc_b)


# ------------------------------ Model wrapper ------------------------------ #

def _pack_indices(batch_sizes, batch_pad):
    """Static numpy index plumbing for packed <-> padded layouts."""
    bs = np.asarray(batch_sizes, dtype=np.int64)
    assert np.all(bs[:-1] >= bs[1:]), "batch_sizes must be non-increasing (sorted packed seq)"
    t_max = len(batch_sizes)
    total = int(bs.sum())
    offsets = np.concatenate([[0], np.cumsum(bs)[:-1]])
    tt, bb = np.meshgrid(np.arange(t_max), np.arange(batch_pad), indexing="ij")
    valid = bb < bs[tt]
    # Row `total` of the padded embedding table is an all-zero pad row.
    scatter_idx = np.where(valid, offsets[tt] + bb, total).astype(np.int32).reshape(-1)
    gather_rows = np.concatenate(
        [t * batch_pad + np.arange(int(n)) for t, n in enumerate(bs)]).astype(np.int32)
    return scatter_idx, gather_rows, total


@functools.partial(jax.jit, static_argnames=("batch_sizes",))
def lstm_lm_forward(tokens, params, batch_sizes):
    """Equivalent of LSTM.forward on a PackedSequence (tokens = packed.data)."""
    hidden = params["lstm"][0][1].shape[0]
    t_max = len(batch_sizes)
    batch = int(batch_sizes[0])
    batch_pad = max(8, ((batch + 7) // 8) * 8)           # sublane multiple

    # Embedding lookup (untied path) — dynamic gather is glue, done in plain JAX.
    emb = params["embedding"][tokens]                    # (T, E)
    e_dim = emb.shape[1]

    # Packed -> padded time-major, as ONE gather (zero pad row appended).
    scatter_idx, gather_rows, _ = _pack_indices(batch_sizes, batch_pad)
    emb_pad = jnp.concatenate([emb, jnp.zeros((1, e_dim), emb.dtype)], axis=0)
    x_flat = emb_pad[scatter_idx]                        # (t_max*batch_pad, E)

    # Fused LSTM stack + fc1 + log_softmax (single Pallas kernel).
    out_pad = fused_lm_call(x_flat, params["lstm"], params["fc_w"], params["fc_b"],
                            hidden=hidden, t_max=t_max, batch_pad=batch_pad)

    # Padded -> packed, as ONE gather.
    return out_pad[gather_rows]                          # (T, V)


# ------------------------------ Pure-JAX reference ------------------------- #

def _ref_forward(tokens, batch_sizes, params):
    hidden = params["lstm"][0][1].shape[0]
    hp = jax.lax.Precision.HIGHEST
    emb = params["embedding"][tokens]
    t_max = len(batch_sizes)
    batch = int(batch_sizes[0])
    x = jnp.zeros((t_max, batch, emb.shape[1]), jnp.float32)
    off = 0
    for t, bs in enumerate(batch_sizes):
        x = x.at[t, :bs].set(emb[off:off + bs])
        off += bs
    for (w_ih, w_hh, b) in params["lstm"]:
        h = jnp.zeros((batch, hidden), jnp.float32)
        c = jnp.zeros((batch, hidden), jnp.float32)
        outs = []
        for t in range(t_max):
            gates = (jnp.dot(x[t], w_ih, precision=hp)
                     + jnp.dot(h, w_hh, precision=hp) + b)
            i = jax.nn.sigmoid(gates[:, 0 * hidden:1 * hidden])
            f = jax.nn.sigmoid(gates[:, 1 * hidden:2 * hidden])
            g = jnp.tanh(gates[:, 2 * hidden:3 * hidden])
            o = jax.nn.sigmoid(gates[:, 3 * hidden:4 * hidden])
            c = f * c + i * g
            h = o * jnp.tanh(c)
            outs.append(h)
        x = jnp.stack(outs, axis=0)
    rows = [x[t, :bs] for t, bs in enumerate(batch_sizes)]
    h_packed = jnp.concatenate(rows, axis=0)
    logits = jnp.dot(h_packed, params["fc_w"], precision=hp) + params["fc_b"]
    return jax.nn.log_softmax(logits, axis=1)


# --------------------------------- Main ------------------------------------ #

def make_params(key, vocab_size, embedding_dim, hidden_dim, gru_layers):
    ks = jax.random.split(key, 4 + 4 * gru_layers)
    stdv = 1.0 / float(np.sqrt(hidden_dim))
    params = {}
    # nn.Embedding: N(0, 1)
    params["embedding"] = jax.random.normal(ks[0], (vocab_size, embedding_dim),
                                            jnp.float32)
    # nn.LSTM weights: U(-1/sqrt(H), 1/sqrt(H)); stored transposed as (in, 4H).
    lstm_params = []
    for layer in range(gru_layers):
        in_dim = embedding_dim if layer == 0 else hidden_dim
        kw = ks[4 + 4 * layer: 8 + 4 * layer]
        w_ih = jax.random.uniform(kw[0], (in_dim, 4 * hidden_dim), jnp.float32,
                                  -stdv, stdv)
        w_hh = jax.random.uniform(kw[1], (hidden_dim, 4 * hidden_dim), jnp.float32,
                                  -stdv, stdv)
        b_ih = jax.random.uniform(kw[2], (1, 4 * hidden_dim), jnp.float32, -stdv, stdv)
        b_hh = jax.random.uniform(kw[3], (1, 4 * hidden_dim), jnp.float32, -stdv, stdv)
        lstm_params.append((w_ih, w_hh, b_ih + b_hh))
    params["lstm"] = tuple(lstm_params)
    # nn.Linear(hidden, vocab): U(-1/sqrt(H), 1/sqrt(H)); stored as (H, V).
    params["fc_w"] = jax.random.uniform(ks[1], (hidden_dim, vocab_size), jnp.float32,
                                        -stdv, stdv)
    params["fc_b"] = jax.random.uniform(ks[2], (1, vocab_size), jnp.float32,
                                        -stdv, stdv)
    return params


if __name__ == "__main__":
    VOCAB = 128
    EMBED = 32
    HIDDEN = 32
    LAYERS = 2          # gru_layers

    key = jax.random.PRNGKey(0)
    pkey, tkey = jax.random.split(key)
    params = make_params(pkey, VOCAB, EMBED, HIDDEN, LAYERS)

    # Packed sequence: 3 sentences with lengths 8, 6, 4 (sorted, descending).
    lengths = [8, 6, 4]
    t_max = max(lengths)
    batch_sizes = tuple(sum(1 for L in lengths if L > t) for t in range(t_max))  # (3,3,3,3,2,2,1,1)
    T = sum(batch_sizes)                                                         # 18 tokens
    tokens = jax.random.randint(tkey, (T,), 0, VOCAB, dtype=jnp.int32)

    out = lstm_lm_forward(tokens, params, batch_sizes)
    out = jax.block_until_ready(out)

    ref = jax.block_until_ready(_ref_forward(tokens, batch_sizes, params))
    np.testing.assert_allclose(np.asarray(out), np.asarray(ref), rtol=5e-3, atol=5e-3)
    assert out.shape == (T, VOCAB)

    print("KERNEL_OK")
</pallas_src>

<mosaic_0001>
module attributes {stable_mosaic.version = 11 : i64} {
  func.func @fused_lm_kernel(%arg0: memref<64x32xf32, #tpu.memory_space<vmem>>, %arg1: memref<32x128xf32, #tpu.memory_space<vmem>>, %arg2: memref<32x128xf32, #tpu.memory_space<vmem>>, %arg3: memref<1x128xf32, #tpu.memory_space<vmem>>, %arg4: memref<32x128xf32, #tpu.memory_space<vmem>>, %arg5: memref<32x128xf32, #tpu.memory_space<vmem>>, %arg6: memref<1x128xf32, #tpu.memory_space<vmem>>, %arg7: memref<32x128xf32, #tpu.memory_space<vmem>>, %arg8: memref<1x128xf32, #tpu.memory_space<vmem>>, %arg9: memref<64x128xf32, #tpu.memory_space<vmem>>, %arg10: memref<64x32xf32, #tpu.memory_space<vmem>>) attributes {dimension_semantics = [], scalar_prefetch = 0 : i64, scratch_operands = 1 : i64, tpu.core_type = #tpu.core_type<tc>} {
    %c0 = arith.constant 0 : index
    %c0_0 = arith.constant 0 : index
    %0 = vector.load %arg0[%c0, %c0_0] : memref<64x32xf32, #tpu.memory_space<vmem>>, vector<64x32xf32>
    %c0_1 = arith.constant 0 : index
    %c0_2 = arith.constant 0 : index
    %1 = vector.load %arg1[%c0_1, %c0_2] : memref<32x128xf32, #tpu.memory_space<vmem>>, vector<32x128xf32>
    %c0_3 = arith.constant 0 : index
    %c0_4 = arith.constant 0 : index
    %2 = vector.load %arg2[%c0_3, %c0_4] : memref<32x128xf32, #tpu.memory_space<vmem>>, vector<32x128xf32>
    %c0_5 = arith.constant 0 : index
    %c0_6 = arith.constant 0 : index
    %3 = vector.load %arg3[%c0_5, %c0_6] : memref<1x128xf32, #tpu.memory_space<vmem>>, vector<1x128xf32>
    %cst = arith.constant dense<0.000000e+00> : vector<64x128xf32>
    %4 = tpu.matmul %0, %1, %cst {dimension_numbers = #tpu.dot_dimension_numbers<[1], [0], [0], [1], [0, 0, 1, 1], [], []>} : vector<64x32xf32>, vector<32x128xf32>, vector<64x128xf32> -> vector<64x128xf32>
    %5 = vector.broadcast %3 : vector<1x128xf32> to vector<64x128xf32>
    %6 = arith.addf %4, %5 : vector<64x128xf32>
    %cst_7 = arith.constant 0.000000e+00 : f32
    %7 = vector.broadcast %cst_7 : f32 to vector<8x32xf32>
    %cst_8 = arith.constant 0.000000e+00 : f32
    %8 = vector.broadcast %cst_8 : f32 to vector<8x32xf32>
    %9 = vector.extract_strided_slice %6 {offsets = [0, 0], sizes = [8, 128], strides = [1, 1]} : vector<64x128xf32> to vector<8x128xf32>
    %cst_9 = arith.constant dense<0.000000e+00> : vector<8x128xf32>
    %10 = tpu.matmul %7, %2, %cst_9 {dimension_numbers = #tpu.dot_dimension_numbers<[1], [0], [0], [1], [0, 0, 1, 1], [], []>} : vector<8x32xf32>, vector<32x128xf32>, vector<8x128xf32> -> vector<8x128xf32>
    %11 = arith.addf %9, %10 : vector<8x128xf32>
    %12 = vector.extract_strided_slice %11 {offsets = [0, 0], sizes = [8, 64], strides = [1, 1]} : vector<8x128xf32> to vector<8x64xf32>
    %13 = arith.negf %12 : vector<8x64xf32>
    %14 = math.exp %13 : vector<8x64xf32>
    %cst_10 = arith.constant 1.000000e+00 : f32
    %15 = vector.broadcast %cst_10 : f32 to vector<8x64xf32>
    %16 = arith.addf %15, %14 : vector<8x64xf32>
    %17 = arith.divf %15, %16 : vector<8x64xf32>
    %18 = vector.extract_strided_slice %17 {offsets = [0, 0], sizes = [8, 32], strides = [1, 1]} : vector<8x64xf32> to vector<8x32xf32>
    %19 = vector.extract_strided_slice %17 {offsets = [0, 32], sizes = [8, 32], strides = [1, 1]} : vector<8x64xf32> to vector<8x32xf32>
    %20 = vector.extract_strided_slice %11 {offsets = [0, 64], sizes = [8, 32], strides = [1, 1]} : vector<8x128xf32> to vector<8x32xf32>
    %21 = math.tanh %20 : vector<8x32xf32>
    %22 = vector.extract_strided_slice %11 {offsets = [0, 96], sizes = [8, 32], strides = [1, 1]} : vector<8x128xf32> to vector<8x32xf32>
    %23 = arith.negf %22 : vector<8x32xf32>
    %24 = math.exp %23 : vector<8x32xf32>
    %cst_11 = arith.constant 1.000000e+00 : f32
    %25 = vector.broadcast %cst_11 : f32 to vector<8x32xf32>
    %26 = arith.addf %25, %24 : vector<8x32xf32>
    %27 = arith.divf %25, %26 : vector<8x32xf32>
    %28 = arith.mulf %19, %8 : vector<8x32xf32>
    %29 = arith.mulf %18, %21 : vector<8x32xf32>
    %30 = arith.addf %28, %29 : vector<8x32xf32>
    %31 = math.tanh %30 : vector<8x32xf32>
    %32 = arith.mulf %27, %31 : vector<8x32xf32>
    %c0_12 = arith.constant 0 : index
    %c0_13 = arith.constant 0 : index
    %33 = vector.load %arg10[%c0_12, %c0_13] : memref<64x32xf32, #tpu.memory_space<vmem>>, vector<8x32xf32>
    tpu.vector_store %arg10[%c0_12, %c0_13], %32 {strides = array<i32>} : memref<64x32xf32, #tpu.memory_space<vmem>>, vector<8x32xf32>,
    %34 = vector.extract_strided_slice %6 {offsets = [8, 0], sizes = [8, 128], strides = [1, 1]} : vector<64x128xf32> to vector<8x128xf32>
    %cst_14 = arith.constant dense<0.000000e+00> : vector<8x128xf32>
    %35 = tpu.matmul %32, %2, %cst_14 {dimension_numbers = #tpu.dot_dimension_numbers<[1], [0], [0], [1], [0, 0, 1, 1], [], []>} : vector<8x32xf32>, vector<32x128xf32>, vector<8x128xf32> -> vector<8x128xf32>
    %36 = arith.addf %34, %35 : vector<8x128xf32>
    %37 = vector.extract_strided_slice %36 {offsets = [0, 0], sizes = [8, 64], strides = [1, 1]} : vector<8x128xf32> to vector<8x64xf32>
    %38 = arith.negf %37 : vector<8x64xf32>
    %39 = math.exp %38 : vector<8x64xf32>
    %cst_15 = arith.constant 1.000000e+00 : f32
    %40 = vector.broadcast %cst_15 : f32 to vector<8x64xf32>
    %41 = arith.addf %40, %39 : vector<8x64xf32>
    %42 = arith.divf %40, %41 : vector<8x64xf32>
    %43 = vector.extract_strided_slice %42 {offsets = [0, 0], sizes = [8, 32], strides = [1, 1]} : vector<8x64xf32> to vector<8x32xf32>
    %44 = vector.extract_strided_slice %42 {offsets = [0, 32], sizes = [8, 32], strides = [1, 1]} : vector<8x64xf32> to vector<8x32xf32>
    %45 = vector.extract_strided_slice %36 {offsets = [0, 64], sizes = [8, 32], strides = [1, 1]} : vector<8x128xf32> to vector<8x32xf32>
    %46 = math.tanh %45 : vector<8x32xf32>
    %47 = vector.extract_strided_slice %36 {offsets = [0, 96], sizes = [8, 32], strides = [1, 1]} : vector<8x128xf32> to vector<8x32xf32>
    %48 = arith.negf %47 : vector<8x32xf32>
    %49 = math.exp %48 : vector<8x32xf32>
    %cst_16 = arith.constant 1.000000e+00 : f32
    %50 = vector.broadcast %cst_16 : f32 to vector<8x32xf32>
    %51 = arith.addf %50, %49 : vector<8x32xf32>
    %52 = arith.divf %50, %51 : vector<8x32xf32>
    %53 = arith.mulf %44, %30 : vector<8x32xf32>
    %54 = arith.mulf %43, %46 : vector<8x32xf32>
    %55 = arith.addf %53, %54 : vector<8x32xf32>
    %56 = math.tanh %55 : vector<8x32xf32>
    %57 = arith.mulf %52, %56 : vector<8x32xf32>
    %c8 = arith.constant 8 : index
    %c0_17 = arith.constant 0 : index
    %58 = vector.load %arg10[%c8, %c0_17] : memref<64x32xf32, #tpu.memory_space<vmem>>, vector<8x32xf32>
    tpu.vector_store %arg10[%c8, %c0_17], %57 {strides = array<i32>} : memref<64x32xf32, #tpu.memory_space<vmem>>, vector<8x32xf32>,
    %59 = vector.extract_strided_slice %6 {offsets = [16, 0], sizes = [8, 128], strides = [1, 1]} : vector<64x128xf32> to vector<8x128xf32>
    %cst_18 = arith.constant dense<0.000000e+00> : vector<8x128xf32>
    %60 = tpu.matmul %57, %2, %cst_18 {dimension_numbers = #tpu.dot_dimension_numbers<[1], [0], [0], [1], [0, 0, 1, 1], [], []>} : vector<8x32xf32>, vector<32x128xf32>, vector<8x128xf32> -> vector<8x128xf32>
    %61 = arith.addf %59, %60 : vector<8x128xf32>
    %62 = vector.extract_strided_slice %61 {offsets = [0, 0], sizes = [8, 64], strides = [1, 1]} : vector<8x128xf32> to vector<8x64xf32>
    %63 = arith.negf %62 : vector<8x64xf32>
    %64 = math.exp %63 : vector<8x64xf32>
    %cst_19 = arith.constant 1.000000e+00 : f32
    %65 = vector.broadcast %cst_19 : f32 to vector<8x64xf32>
    %66 = arith.addf %65, %64 : vector<8x64xf32>
    %67 = arith.divf %65, %66 : vector<8x64xf32>
    %68 = vector.extract_strided_slice %67 {offsets = [0, 0], sizes = [8, 32], strides = [1, 1]} : vector<8x64xf32> to vector<8x32xf32>
    %69 = vector.extract_strided_slice %67 {offsets = [0, 32], sizes = [8, 32], strides = [1, 1]} : vector<8x64xf32> to vector<8x32xf32>
    %70 = vector.extract_strided_slice %61 {offsets = [0, 64], sizes = [8, 32], strides = [1, 1]} : vector<8x128xf32> to vector<8x32xf32>
    %71 = math.tanh %70 : vector<8x32xf32>
    %72 = vector.extract_strided_slice %61 {offsets = [0, 96], sizes = [8, 32], strides = [1, 1]} : vector<8x128xf32> to vector<8x32xf32>
    %73 = arith.negf %72 : vector<8x32xf32>
    %74 = math.exp %73 : vector<8x32xf32>
    %cst_20 = arith.constant 1.000000e+00 : f32
    %75 = vector.broadcast %cst_20 : f32 to vector<8x32xf32>
    %76 = arith.addf %75, %74 : vector<8x32xf32>
    %77 = arith.divf %75, %76 : vector<8x32xf32>
    %78 = arith.mulf %69, %55 : vector<8x32xf32>
    %79 = arith.mulf %68, %71 : vector<8x32xf32>
    %80 = arith.addf %78, %79 : vector<8x32xf32>
    %81 = math.tanh %80 : vector<8x32xf32>
    %82 = arith.mulf %77, %81 : vector<8x32xf32>
    %c16 = arith.constant 16 : index
    %c0_21 = arith.constant 0 : index
    %83 = vector.load %arg10[%c16, %c0_21] : memref<64x32xf32, #tpu.memory_space<vmem>>, vector<8x32xf32>
    tpu.vector_store %arg10[%c16, %c0_21], %82 {strides = array<i32>} : memref<64x32xf32, #tpu.memory_space<vmem>>, vector<8x32xf32>,
    %84 = vector.extract_strided_slice %6 {offsets = [24, 0], sizes = [8, 128], strides = [1, 1]} : vector<64x128xf32> to vector<8x128xf32>
    %cst_22 = arith.constant dense<0.000000e+00> : vector<8x128xf32>
    %85 = tpu.matmul %82, %2, %cst_22 {dimension_numbers = #tpu.dot_dimension_numbers<[1], [0], [0], [1], [0, 0, 1, 1], [], []>} : vector<8x32xf32>, vector<32x128xf32>, vector<8x128xf32> -> vector<8x128xf32>
    %86 = arith.addf %84, %85 : vector<8x128xf32>
    %87 = vector.extract_strided_slice %86 {offsets = [0, 0], sizes = [8, 64], strides = [1, 1]} : vector<8x128xf32> to vector<8x64xf32>
    %88 = arith.negf %87 : vector<8x64xf32>
    %89 = math.exp %88 : vector<8x64xf32>
    %cst_23 = arith.constant 1.000000e+00 : f32
    %90 = vector.broadcast %cst_23 : f32 to vector<8x64xf32>
    %91 = arith.addf %90, %89 : vector<8x64xf32>
    %92 = arith.divf %90, %91 : vector<8x64xf32>
    %93 = vector.extract_strided_slice %92 {offsets = [0, 0], sizes = [8, 32], strides = [1, 1]} : vector<8x64xf32> to vector<8x32xf32>
    %94 = vector.extract_strided_slice %92 {offsets = [0, 32], sizes = [8, 32], strides = [1, 1]} : vector<8x64xf32> to vector<8x32xf32>
    %95 = vector.extract_strided_slice %86 {offsets = [0, 64], sizes = [8, 32], strides = [1, 1]} : vector<8x128xf32> to vector<8x32xf32>
    %96 = math.tanh %95 : vector<8x32xf32>
    %97 = vector.extract_strided_slice %86 {offsets = [0, 96], sizes = [8, 32], strides = [1, 1]} : vector<8x128xf32> to vector<8x32xf32>
    %98 = arith.negf %97 : vector<8x32xf32>
    %99 = math.exp %98 : vector<8x32xf32>
    %cst_24 = arith.constant 1.000000e+00 : f32
    %100 = vector.broadcast %cst_24 : f32 to vector<8x32xf32>
    %101 = arith.addf %100, %99 : vector<8x32xf32>
    %102 = arith.divf %100, %101 : vector<8x32xf32>
    %103 = arith.mulf %94, %80 : vector<8x32xf32>
    %104 = arith.mulf %93, %96 : vector<8x32xf32>
    %105 = arith.addf %103, %104 : vector<8x32xf32>
    %106 = math.tanh %105 : vector<8x32xf32>
    %107 = arith.mulf %102, %106 : vector<8x32xf32>
    %c24 = arith.constant 24 : index
    %c0_25 = arith.constant 0 : index
    %108 = vector.load %arg10[%c24, %c0_25] : memref<64x32xf32, #tpu.memory_space<vmem>>, vector<8x32xf32>
    tpu.vector_store %arg10[%c24, %c0_25], %107 {strides = array<i32>} : memref<64x32xf32, #tpu.memory_space<vmem>>, vector<8x32xf32>,
    %109 = vector.extract_strided_slice %6 {offsets = [32, 0], sizes = [8, 128], strides = [1, 1]} : vector<64x128xf32> to vector<8x128xf32>
    %cst_26 = arith.constant dense<0.000000e+00> : vector<8x128xf32>
    %110 = tpu.matmul %107, %2, %cst_26 {dimension_numbers = #tpu.dot_dimension_numbers<[1], [0], [0], [1], [0, 0, 1, 1], [], []>} : vector<8x32xf32>, vector<32x128xf32>, vector<8x128xf32> -> vector<8x128xf32>
    %111 = arith.addf %109, %110 : vector<8x128xf32>
    %112 = vector.extract_strided_slice %111 {offsets = [0, 0], sizes = [8, 64], strides = [1, 1]} : vector<8x128xf32> to vector<8x64xf32>
    %113 = arith.negf %112 : vector<8x64xf32>
    %114 = math.exp %113 : vector<8x64xf32>
    %cst_27 = arith.constant 1.000000e+00 : f32
    %115 = vector.broadcast %cst_27 : f32 to vector<8x64xf32>
    %116 = arith.addf %115, %114 : vector<8x64xf32>
    %117 = arith.divf %115, %116 : vector<8x64xf32>
    %118 = vector.extract_strided_slice %117 {offsets = [0, 0], sizes = [8, 32], strides = [1, 1]} : vector<8x64xf32> to vector<8x32xf32>
    %119 = vector.extract_strided_slice %117 {offsets = [0, 32], sizes = [8, 32], strides = [1, 1]} : vector<8x64xf32> to vector<8x32xf32>
    %120 = vector.extract_strided_slice %111 {offsets = [0, 64], sizes = [8, 32], strides = [1, 1]} : vector<8x128xf32> to vector<8x32xf32>
    %121 = math.tanh %120 : vector<8x32xf32>
    %122 = vector.extract_strided_slice %111 {offsets = [0, 96], sizes = [8, 32], strides = [1, 1]} : vector<8x128xf32> to vector<8x32xf32>
    %123 = arith.negf %122 : vector<8x32xf32>
    %124 = math.exp %123 : vector<8x32xf32>
    %cst_28 = arith.constant 1.000000e+00 : f32
    %125 = vector.broadcast %cst_28 : f32 to vector<8x32xf32>
    %126 = arith.addf %125, %124 : vector<8x32xf32>
    %127 = arith.divf %125, %126 : vector<8x32xf32>
    %128 = arith.mulf %119, %105 : vector<8x32xf32>
    %129 = arith.mulf %118, %121 : vector<8x32xf32>
    %130 = arith.addf %128, %129 : vector<8x32xf32>
    %131 = math.tanh %130 : vector<8x32xf32>
    %132 = arith.mulf %127, %131 : vector<8x32xf32>
    %c32 = arith.constant 32 : index
    %c0_29 = arith.constant 0 : index
    %133 = vector.load %arg10[%c32, %c0_29] : memref<64x32xf32, #tpu.memory_space<vmem>>, vector<8x32xf32>
    tpu.vector_store %arg10[%c32, %c0_29], %132 {strides = array<i32>} : memref<64x32xf32, #tpu.memory_space<vmem>>, vector<8x32xf32>,
    %134 = vector.extract_strided_slice %6 {offsets = [40, 0], sizes = [8, 128], strides = [1, 1]} : vector<64x128xf32> to vector<8x128xf32>
    %cst_30 = arith.constant dense<0.000000e+00> : vector<8x128xf32>
    %135 = tpu.matmul %132, %2, %cst_30 {dimension_numbers = #tpu.dot_dimension_numbers<[1], [0], [0], [1], [0, 0, 1, 1], [], []>} : vector<8x32xf32>, vector<32x128xf32>, vector<8x128xf32> -> vector<8x128xf32>
    %136 = arith.addf %134, %135 : vector<8x128xf32>
    %137 = vector.extract_strided_slice %136 {offsets = [0, 0], sizes = [8, 64], strides = [1, 1]} : vector<8x128xf32> to vector<8x64xf32>
    %138 = arith.negf %137 : vector<8x64xf32>
    %139 = math.exp %138 : vector<8x64xf32>
    %cst_31 = arith.constant 1.000000e+00 : f32
    %140 = vector.broadcast %cst_31 : f32 to vector<8x64xf32>
    %141 = arith.addf %140, %139 : vector<8x64xf32>
    %142 = arith.divf %140, %141 : vector<8x64xf32>
    %143 = vector.extract_strided_slice %142 {offsets = [0, 0], sizes = [8, 32], strides = [1, 1]} : vector<8x64xf32> to vector<8x32xf32>
    %144 = vector.extract_strided_slice %142 {offsets = [0, 32], sizes = [8, 32], strides = [1, 1]} : vector<8x64xf32> to vector<8x32xf32>
    %145 = vector.extract_strided_slice %136 {offsets = [0, 64], sizes = [8, 32], strides = [1, 1]} : vector<8x128xf32> to vector<8x32xf32>
    %146 = math.tanh %145 : vector<8x32xf32>
    %147 = vector.extract_strided_slice %136 {offsets = [0, 96], sizes = [8, 32], strides = [1, 1]} : vector<8x128xf32> to vector<8x32xf32>
    %148 = arith.negf %147 : vector<8x32xf32>
    %149 = math.exp %148 : vector<8x32xf32>
    %cst_32 = arith.constant 1.000000e+00 : f32
    %150 = vector.broadcast %cst_32 : f32 to vector<8x32xf32>
    %151 = arith.addf %150, %149 : vector<8x32xf32>
    %152 = arith.divf %150, %151 : vector<8x32xf32>
    %153 = arith.mulf %144, %130 : vector<8x32xf32>
    %154 = arith.mulf %143, %146 : vector<8x32xf32>
    %155 = arith.addf %153, %154 : vector<8x32xf32>
    %156 = math.tanh %155 : vector<8x32xf32>
    %157 = arith.mulf %152, %156 : vector<8x32xf32>
    %c40 = arith.constant 40 : index
    %c0_33 = arith.constant 0 : index
    %158 = vector.load %arg10[%c40, %c0_33] : memref<64x32xf32, #tpu.memory_space<vmem>>, vector<8x32xf32>
    tpu.vector_store %arg10[%c40, %c0_33], %157 {strides = array<i32>} : memref<64x32xf32, #tpu.memory_space<vmem>>, vector<8x32xf32>,
    %159 = vector.extract_strided_slice %6 {offsets = [48, 0], sizes = [8, 128], strides = [1, 1]} : vector<64x128xf32> to vector<8x128xf32>
    %cst_34 = arith.constant dense<0.000000e+00> : vector<8x128xf32>
    %160 = tpu.matmul %157, %2, %cst_34 {dimension_numbers = #tpu.dot_dimension_numbers<[1], [0], [0], [1], [0, 0, 1, 1], [], []>} : vector<8x32xf32>, vector<32x128xf32>, vector<8x128xf32> -> vector<8x128xf32>
    %161 = arith.addf %159, %160 : vector<8x128xf32>
    %162 = vector.extract_strided_slice %161 {offsets = [0, 0], sizes = [8, 64], strides = [1, 1]} : vector<8x128xf32> to vector<8x64xf32>
    %163 = arith.negf %162 : vector<8x64xf32>
    %164 = math.exp %163 : vector<8x64xf32>
    %cst_35 = arith.constant 1.000000e+00 : f32
    %165 = vector.broadcast %cst_35 : f32 to vector<8x64xf32>
    %166 = arith.addf %165, %164 : vector<8x64xf32>
    %167 = arith.divf %165, %166 : vector<8x64xf32>
    %168 = vector.extract_strided_slice %167 {offsets = [0, 0], sizes = [8, 32], strides = [1, 1]} : vector<8x64xf32> to vector<8x32xf32>
    %169 = vector.extract_strided_slice %167 {offsets = [0, 32], sizes = [8, 32], strides = [1, 1]} : vector<8x64xf32> to vector<8x32xf32>
    %170 = vector.extract_strided_slice %161 {offsets = [0, 64], sizes = [8, 32], strides = [1, 1]} : vector<8x128xf32> to vector<8x32xf32>
    %171 = math.tanh %170 : vector<8x32xf32>
    %172 = vector.extract_strided_slice %161 {offsets = [0, 96], sizes = [8, 32], strides = [1, 1]} : vector<8x128xf32> to vector<8x32xf32>
    %173 = arith.negf %172 : vector<8x32xf32>
    %174 = math.exp %173 : vector<8x32xf32>
    %cst_36 = arith.constant 1.000000e+00 : f32
    %175 = vector.broadcast %cst_36 : f32 to vector<8x32xf32>
    %176 = arith.addf %175, %174 : vector<8x32xf32>
    %177 = arith.divf %175, %176 : vector<8x32xf32>
    %178 = arith.mulf %169, %155 : vector<8x32xf32>
    %179 = arith.mulf %168, %171 : vector<8x32xf32>
    %180 = arith.addf %178, %179 : vector<8x32xf32>
    %181 = math.tanh %180 : vector<8x32xf32>
    %182 = arith.mulf %177, %181 : vector<8x32xf32>
    %c48 = arith.constant 48 : index
    %c0_37 = arith.constant 0 : index
    %183 = vector.load %arg10[%c48, %c0_37] : memref<64x32xf32, #tpu.memory_space<vmem>>, vector<8x32xf32>
    tpu.vector_store %arg10[%c48, %c0_37], %182 {strides = array<i32>} : memref<64x32xf32, #tpu.memory_space<vmem>>, vector<8x32xf32>,
    %184 = vector.extract_strided_slice %6 {offsets = [56, 0], sizes = [8, 128], strides = [1, 1]} : vector<64x128xf32> to vector<8x128xf32>
    %cst_38 = arith.constant dense<0.000000e+00> : vector<8x128xf32>
    %185 = tpu.matmul %182, %2, %cst_38 {dimension_numbers = #tpu.dot_dimension_numbers<[1], [0], [0], [1], [0, 0, 1, 1], [], []>} : vector<8x32xf32>, vector<32x128xf32>, vector<8x128xf32> -> vector<8x128xf32>
    %186 = arith.addf %184, %185 : vector<8x128xf32>
    %187 = vector.extract_strided_slice %186 {offsets = [0, 0], sizes = [8, 64], strides = [1, 1]} : vector<8x128xf32> to vector<8x64xf32>
    %188 = arith.negf %187 : vector<8x64xf32>
    %189 = math.exp %188 : vector<8x64xf32>
    %cst_39 = arith.constant 1.000000e+00 : f32
    %190 = vector.broadcast %cst_39 : f32 to vector<8x64xf32>
    %191 = arith.addf %190, %189 : vector<8x64xf32>
    %192 = arith.divf %190, %191 : vector<8x64xf32>
    %193 = vector.extract_strided_slice %192 {offsets = [0, 0], sizes = [8, 32], strides = [1, 1]} : vector<8x64xf32> to vector<8x32xf32>
    %194 = vector.extract_strided_slice %192 {offsets = [0, 32], sizes = [8, 32], strides = [1, 1]} : vector<8x64xf32> to vector<8x32xf32>
    %195 = vector.extract_strided_slice %186 {offsets = [0, 64], sizes = [8, 32], strides = [1, 1]} : vector<8x128xf32> to vector<8x32xf32>
    %196 = math.tanh %195 : vector<8x32xf32>
    %197 = vector.extract_strided_slice %186 {offsets = [0, 96], sizes = [8, 32], strides = [1, 1]} : vector<8x128xf32> to vector<8x32xf32>
    %198 = arith.negf %197 : vector<8x32xf32>
    %199 = math.exp %198 : vector<8x32xf32>
    %cst_40 = arith.constant 1.000000e+00 : f32
    %200 = vector.broadcast %cst_40 : f32 to vector<8x32xf32>
    %201 = arith.addf %200, %199 : vector<8x32xf32>
    %202 = arith.divf %200, %201 : vector<8x32xf32>
    %203 = arith.mulf %194, %180 : vector<8x32xf32>
    %204 = arith.mulf %193, %196 : vector<8x32xf32>
    %205 = arith.addf %203, %204 : vector<8x32xf32>
    %206 = math.tanh %205 : vector<8x32xf32>
    %207 = arith.mulf %202, %206 : vector<8x32xf32>
    %c56 = arith.constant 56 : index
    %c0_41 = arith.constant 0 : index
    %208 = vector.load %arg10[%c56, %c0_41] : memref<64x32xf32, #tpu.memory_space<vmem>>, vector<8x32xf32>
    tpu.vector_store %arg10[%c56, %c0_41], %207 {strides = array<i32>} : memref<64x32xf32, #tpu.memory_space<vmem>>, vector<8x32xf32>,
    %c0_42 = arith.constant 0 : index
    %c0_43 = arith.constant 0 : index
    %209 = vector.load %arg10[%c0_42, %c0_43] : memref<64x32xf32, #tpu.memory_space<vmem>>, vector<64x32xf32>
    %c0_44 = arith.constant 0 : index
    %c0_45 = arith.constant 0 : index
    %210 = vector.load %arg4[%c0_44, %c0_45] : memref<32x128xf32, #tpu.memory_space<vmem>>, vector<32x128xf32>
    %c0_46 = arith.constant 0 : index
    %c0_47 = arith.constant 0 : index
    %211 = vector.load %arg5[%c0_46, %c0_47] : memref<32x128xf32, #tpu.memory_space<vmem>>, vector<32x128xf32>
    %c0_48 = arith.constant 0 : index
    %c0_49 = arith.constant 0 : index
    %212 = vector.load %arg6[%c0_48, %c0_49] : memref<1x128xf32, #tpu.memory_space<vmem>>, vector<1x128xf32>
    %cst_50 = arith.constant dense<0.000000e+00> : vector<64x128xf32>
    %213 = tpu.matmul %209, %210, %cst_50 {dimension_numbers = #tpu.dot_dimension_numbers<[1], [0], [0], [1], [0, 0, 1, 1], [], []>} : vector<64x32xf32>, vector<32x128xf32>, vector<64x128xf32> -> vector<64x128xf32>
    %214 = vector.broadcast %212 : vector<1x128xf32> to vector<64x128xf32>
    %215 = arith.addf %213, %214 : vector<64x128xf32>
    %cst_51 = arith.constant 0.000000e+00 : f32
    %216 = vector.broadcast %cst_51 : f32 to vector<8x32xf32>
    %cst_52 = arith.constant 0.000000e+00 : f32
    %217 = vector.broadcast %cst_52 : f32 to vector<8x32xf32>
    %218 = vector.extract_strided_slice %215 {offsets = [0, 0], sizes = [8, 128], strides = [1, 1]} : vector<64x128xf32> to vector<8x128xf32>
    %cst_53 = arith.constant dense<0.000000e+00> : vector<8x128xf32>
    %219 = tpu.matmul %216, %211, %cst_53 {dimension_numbers = #tpu.dot_dimension_numbers<[1], [0], [0], [1], [0, 0, 1, 1], [], []>} : vector<8x32xf32>, vector<32x128xf32>, vector<8x128xf32> -> vector<8x128xf32>
    %220 = arith.addf %218, %219 : vector<8x128xf32>
    %221 = vector.extract_strided_slice %220 {offsets = [0, 0], sizes = [8, 64], strides = [1, 1]} : vector<8x128xf32> to vector<8x64xf32>
    %222 = arith.negf %221 : vector<8x64xf32>
    %223 = math.exp %222 : vector<8x64xf32>
    %cst_54 = arith.constant 1.000000e+00 : f32
    %224 = vector.broadcast %cst_54 : f32 to vector<8x64xf32>
    %225 = arith.addf %224, %223 : vector<8x64xf32>
    %226 = arith.divf %224, %225 : vector<8x64xf32>
    %227 = vector.extract_strided_slice %226 {offsets = [0, 0], sizes = [8, 32], strides = [1, 1]} : vector<8x64xf32> to vector<8x32xf32>
    %228 = vector.extract_strided_slice %226 {offsets = [0, 32], sizes = [8, 32], strides = [1, 1]} : vector<8x64xf32> to vector<8x32xf32>
    %229 = vector.extract_strided_slice %220 {offsets = [0, 64], sizes = [8, 32], strides = [1, 1]} : vector<8x128xf32> to vector<8x32xf32>
    %230 = math.tanh %229 : vector<8x32xf32>
    %231 = vector.extract_strided_slice %220 {offsets = [0, 96], sizes = [8, 32], strides = [1, 1]} : vector<8x128xf32> to vector<8x32xf32>
    %232 = arith.negf %231 : vector<8x32xf32>
    %233 = math.exp %232 : vector<8x32xf32>
    %cst_55 = arith.constant 1.000000e+00 : f32
    %234 = vector.broadcast %cst_55 : f32 to vector<8x32xf32>
    %235 = arith.addf %234, %233 : vector<8x32xf32>
    %236 = arith.divf %234, %235 : vector<8x32xf32>
    %237 = arith.mulf %228, %217 : vector<8x32xf32>
    %238 = arith.mulf %227, %230 : vector<8x32xf32>
    %239 = arith.addf %237, %238 : vector<8x32xf32>
    %240 = math.tanh %239 : vector<8x32xf32>
    %241 = arith.mulf %236, %240 : vector<8x32xf32>
    %c0_56 = arith.constant 0 : index
    %c0_57 = arith.constant 0 : index
    %242 = vector.load %arg10[%c0_56, %c0_57] : memref<64x32xf32, #tpu.memory_space<vmem>>, vector<8x32xf32>
    tpu.vector_store %arg10[%c0_56, %c0_57], %241 {strides = array<i32>} : memref<64x32xf32, #tpu.memory_space<vmem>>, vector<8x32xf32>,
    %243 = vector.extract_strided_slice %215 {offsets = [8, 0], sizes = [8, 128], strides = [1, 1]} : vector<64x128xf32> to vector<8x128xf32>
    %cst_58 = arith.constant dense<0.000000e+00> : vector<8x128xf32>
    %244 = tpu.matmul %241, %211, %cst_58 {dimension_numbers = #tpu.dot_dimension_numbers<[1], [0], [0], [1], [0, 0, 1, 1], [], []>} : vector<8x32xf32>, vector<32x128xf32>, vector<8x128xf32> -> vector<8x128xf32>
    %245 = arith.addf %243, %244 : vector<8x128xf32>
    %246 = vector.extract_strided_slice %245 {offsets = [0, 0], sizes = [8, 64], strides = [1, 1]} : vector<8x128xf32> to vector<8x64xf32>
    %247 = arith.negf %246 : vector<8x64xf32>
    %248 = math.exp %247 : vector<8x64xf32>
    %cst_59 = arith.constant 1.000000e+00 : f32
    %249 = vector.broadcast %cst_59 : f32 to vector<8x64xf32>
    %250 = arith.addf %249, %248 : vector<8x64xf32>
    %251 = arith.divf %249, %250 : vector<8x64xf32>
    %252 = vector.extract_strided_slice %251 {offsets = [0, 0], sizes = [8, 32], strides = [1, 1]} : vector<8x64xf32> to vector<8x32xf32>
    %253 = vector.extract_strided_slice %251 {offsets = [0, 32], sizes = [8, 32], strides = [1, 1]} : vector<8x64xf32> to vector<8x32xf32>
    %254 = vector.extract_strided_slice %245 {offsets = [0, 64], sizes = [8, 32], strides = [1, 1]} : vector<8x128xf32> to vector<8x32xf32>
    %255 = math.tanh %254 : vector<8x32xf32>
    %256 = vector.extract_strided_slice %245 {offsets = [0, 96], sizes = [8, 32], strides = [1, 1]} : vector<8x128xf32> to vector<8x32xf32>
    %257 = arith.negf %256 : vector<8x32xf32>
    %258 = math.exp %257 : vector<8x32xf32>
    %cst_60 = arith.constant 1.000000e+00 : f32
    %259 = vector.broadcast %cst_60 : f32 to vector<8x32xf32>
    %260 = arith.addf %259, %258 : vector<8x32xf32>
    %261 = arith.divf %259, %260 : vector<8x32xf32>
    %262 = arith.mulf %253, %239 : vector<8x32xf32>
    %263 = arith.mulf %252, %255 : vector<8x32xf32>
    %264 = arith.addf %262, %263 : vector<8x32xf32>
    %265 = math.tanh %264 : vector<8x32xf32>
    %266 = arith.mulf %261, %265 : vector<8x32xf32>
    %c8_61 = arith.constant 8 : index
    %c0_62 = arith.constant 0 : index
    %267 = vector.load %arg10[%c8_61, %c0_62] : memref<64x32xf32, #tpu.memory_space<vmem>>, vector<8x32xf32>
    tpu.vector_store %arg10[%c8_61, %c0_62], %266 {strides = array<i32>} : memref<64x32xf32, #tpu.memory_space<vmem>>, vector<8x32xf32>,
    %268 = vector.extract_strided_slice %215 {offsets = [16, 0], sizes = [8, 128], strides = [1, 1]} : vector<64x128xf32> to vector<8x128xf32>
    %cst_63 = arith.constant dense<0.000000e+00> : vector<8x128xf32>
    %269 = tpu.matmul %266, %211, %cst_63 {dimension_numbers = #tpu.dot_dimension_numbers<[1], [0], [0], [1], [0, 0, 1, 1], [], []>} : vector<8x32xf32>, vector<32x128xf32>, vector<8x128xf32> -> vector<8x128xf32>
    %270 = arith.addf %268, %269 : vector<8x128xf32>
    %271 = vector.extract_strided_slice %270 {offsets = [0, 0], sizes = [8, 64], strides = [1, 1]} : vector<8x128xf32> to vector<8x64xf32>
    %272 = arith.negf %271 : vector<8x64xf32>
    %273 = math.exp %272 : vector<8x64xf32>
    %cst_64 = arith.constant 1.000000e+00 : f32
    %274 = vector.broadcast %cst_64 : f32 to vector<8x64xf32>
    %275 = arith.addf %274, %273 : vector<8x64xf32>
    %276 = arith.divf %274, %275 : vector<8x64xf32>
    %277 = vector.extract_strided_slice %276 {offsets = [0, 0], sizes = [8, 32], strides = [1, 1]} : vector<8x64xf32> to vector<8x32xf32>
    %278 = vector.extract_strided_slice %276 {offsets = [0, 32], sizes = [8, 32], strides = [1, 1]} : vector<8x64xf32> to vector<8x32xf32>
    %279 = vector.extract_strided_slice %270 {offsets = [0, 64], sizes = [8, 32], strides = [1, 1]} : vector<8x128xf32> to vector<8x32xf32>
    %280 = math.tanh %279 : vector<8x32xf32>
    %281 = vector.extract_strided_slice %270 {offsets = [0, 96], sizes = [8, 32], strides = [1, 1]} : vector<8x128xf32> to vector<8x32xf32>
    %282 = arith.negf %281 : vector<8x32xf32>
    %283 = math.exp %282 : vector<8x32xf32>
    %cst_65 = arith.constant 1.000000e+00 : f32
    %284 = vector.broadcast %cst_65 : f32 to vector<8x32xf32>
    %285 = arith.addf %284, %283 : vector<8x32xf32>
    %286 = arith.divf %284, %285 : vector<8x32xf32>
    %287 = arith.mulf %278, %264 : vector<8x32xf32>
    %288 = arith.mulf %277, %280 : vector<8x32xf32>
    %289 = arith.addf %287, %288 : vector<8x32xf32>
    %290 = math.tanh %289 : vector<8x32xf32>
    %291 = arith.mulf %286, %290 : vector<8x32xf32>
    %c16_66 = arith.constant 16 : index
    %c0_67 = arith.constant 0 : index
    %292 = vector.load %arg10[%c16_66, %c0_67] : memref<64x32xf32, #tpu.memory_space<vmem>>, vector<8x32xf32>
    tpu.vector_store %arg10[%c16_66, %c0_67], %291 {strides = array<i32>} : memref<64x32xf32, #tpu.memory_space<vmem>>, vector<8x32xf32>,
    %293 = vector.extract_strided_slice %215 {offsets = [24, 0], sizes = [8, 128], strides = [1, 1]} : vector<64x128xf32> to vector<8x128xf32>
    %cst_68 = arith.constant dense<0.000000e+00> : vector<8x128xf32>
    %294 = tpu.matmul %291, %211, %cst_68 {dimension_numbers = #tpu.dot_dimension_numbers<[1], [0], [0], [1], [0, 0, 1, 1], [], []>} : vector<8x32xf32>, vector<32x128xf32>, vector<8x128xf32> -> vector<8x128xf32>
    %295 = arith.addf %293, %294 : vector<8x128xf32>
    %296 = vector.extract_strided_slice %295 {offsets = [0, 0], sizes = [8, 64], strides = [1, 1]} : vector<8x128xf32> to vector<8x64xf32>
    %297 = arith.negf %296 : vector<8x64xf32>
    %298 = math.exp %297 : vector<8x64xf32>
    %cst_69 = arith.constant 1.000000e+00 : f32
    %299 = vector.broadcast %cst_69 : f32 to vector<8x64xf32>
    %300 = arith.addf %299, %298 : vector<8x64xf32>
    %301 = arith.divf %299, %300 : vector<8x64xf32>
    %302 = vector.extract_strided_slice %301 {offsets = [0, 0], sizes = [8, 32], strides = [1, 1]} : vector<8x64xf32> to vector<8x32xf32>
    %303 = vector.extract_strided_slice %301 {offsets = [0, 32], sizes = [8, 32], strides = [1, 1]} : vector<8x64xf32> to vector<8x32xf32>
    %304 = vector.extract_strided_slice %295 {offsets = [0, 64], sizes = [8, 32], strides = [1, 1]} : vector<8x128xf32> to vector<8x32xf32>
    %305 = math.tanh %304 : vector<8x32xf32>
    %306 = vector.extract_strided_slice %295 {offsets = [0, 96], sizes = [8, 32], strides = [1, 1]} : vector<8x128xf32> to vector<8x32xf32>
    %307 = arith.negf %306 : vector<8x32xf32>
    %308 = math.exp %307 : vector<8x32xf32>
    %cst_70 = arith.constant 1.000000e+00 : f32
    %309 = vector.broadcast %cst_70 : f32 to vector<8x32xf32>
    %310 = arith.addf %309, %308 : vector<8x32xf32>
    %311 = arith.divf %309, %310 : vector<8x32xf32>
    %312 = arith.mulf %303, %289 : vector<8x32xf32>
    %313 = arith.mulf %302, %305 : vector<8x32xf32>
    %314 = arith.addf %312, %313 : vector<8x32xf32>
    %315 = math.tanh %314 : vector<8x32xf32>
    %316 = arith.mulf %311, %315 : vector<8x32xf32>
    %c24_71 = arith.constant 24 : index
    %c0_72 = arith.constant 0 : index
    %317 = vector.load %arg10[%c24_71, %c0_72] : memref<64x32xf32, #tpu.memory_space<vmem>>, vector<8x32xf32>
    tpu.vector_store %arg10[%c24_71, %c0_72], %316 {strides = array<i32>} : memref<64x32xf32, #tpu.memory_space<vmem>>, vector<8x32xf32>,
    %318 = vector.extract_strided_slice %215 {offsets = [32, 0], sizes = [8, 128], strides = [1, 1]} : vector<64x128xf32> to vector<8x128xf32>
    %cst_73 = arith.constant dense<0.000000e+00> : vector<8x128xf32>
    %319 = tpu.matmul %316, %211, %cst_73 {dimension_numbers = #tpu.dot_dimension_numbers<[1], [0], [0], [1], [0, 0, 1, 1], [], []>} : vector<8x32xf32>, vector<32x128xf32>, vector<8x128xf32> -> vector<8x128xf32>
    %320 = arith.addf %318, %319 : vector<8x128xf32>
    %321 = vector.extract_strided_slice %320 {offsets = [0, 0], sizes = [8, 64], strides = [1, 1]} : vector<8x128xf32> to vector<8x64xf32>
    %322 = arith.negf %321 : vector<8x64xf32>
    %323 = math.exp %322 : vector<8x64xf32>
    %cst_74 = arith.constant 1.000000e+00 : f32
    %324 = vector.broadcast %cst_74 : f32 to vector<8x64xf32>
    %325 = arith.addf %324, %323 : vector<8x64xf32>
    %326 = arith.divf %324, %325 : vector<8x64xf32>
    %327 = vector.extract_strided_slice %326 {offsets = [0, 0], sizes = [8, 32], strides = [1, 1]} : vector<8x64xf32> to vector<8x32xf32>
    %328 = vector.extract_strided_slice %326 {offsets = [0, 32], sizes = [8, 32], strides = [1, 1]} : vector<8x64xf32> to vector<8x32xf32>
    %329 = vector.extract_strided_slice %320 {offsets = [0, 64], sizes = [8, 32], strides = [1, 1]} : vector<8x128xf32> to vector<8x32xf32>
    %330 = math.tanh %329 : vector<8x32xf32>
    %331 = vector.extract_strided_slice %320 {offsets = [0, 96], sizes = [8, 32], strides = [1, 1]} : vector<8x128xf32> to vector<8x32xf32>
    %332 = arith.negf %331 : vector<8x32xf32>
    %333 = math.exp %332 : vector<8x32xf32>
    %cst_75 = arith.constant 1.000000e+00 : f32
    %334 = vector.broadcast %cst_75 : f32 to vector<8x32xf32>
    %335 = arith.addf %334, %333 : vector<8x32xf32>
    %336 = arith.divf %334, %335 : vector<8x32xf32>
    %337 = arith.mulf %328, %314 : vector<8x32xf32>
    %338 = arith.mulf %327, %330 : vector<8x32xf32>
    %339 = arith.addf %337, %338 : vector<8x32xf32>
    %340 = math.tanh %339 : vector<8x32xf32>
    %341 = arith.mulf %336, %340 : vector<8x32xf32>
    %c32_76 = arith.constant 32 : index
    %c0_77 = arith.constant 0 : index
    %342 = vector.load %arg10[%c32_76, %c0_77] : memref<64x32xf32, #tpu.memory_space<vmem>>, vector<8x32xf32>
    tpu.vector_store %arg10[%c32_76, %c0_77], %341 {strides = array<i32>} : memref<64x32xf32, #tpu.memory_space<vmem>>, vector<8x32xf32>,
    %343 = vector.extract_strided_slice %215 {offsets = [40, 0], sizes = [8, 128], strides = [1, 1]} : vector<64x128xf32> to vector<8x128xf32>
    %cst_78 = arith.constant dense<0.000000e+00> : vector<8x128xf32>
    %344 = tpu.matmul %341, %211, %cst_78 {dimension_numbers = #tpu.dot_dimension_numbers<[1], [0], [0], [1], [0, 0, 1, 1], [], []>} : vector<8x32xf32>, vector<32x128xf32>, vector<8x128xf32> -> vector<8x128xf32>
    %345 = arith.addf %343, %344 : vector<8x128xf32>
    %346 = vector.extract_strided_slice %345 {offsets = [0, 0], sizes = [8, 64], strides = [1, 1]} : vector<8x128xf32> to vector<8x64xf32>
    %347 = arith.negf %346 : vector<8x64xf32>
    %348 = math.exp %347 : vector<8x64xf32>
    %cst_79 = arith.constant 1.000000e+00 : f32
    %349 = vector.broadcast %cst_79 : f32 to vector<8x64xf32>
    %350 = arith.addf %349, %348 : vector<8x64xf32>
    %351 = arith.divf %349, %350 : vector<8x64xf32>
    %352 = vector.extract_strided_slice %351 {offsets = [0, 0], sizes = [8, 32], strides = [1, 1]} : vector<8x64xf32> to vector<8x32xf32>
    %353 = vector.extract_strided_slice %351 {offsets = [0, 32], sizes = [8, 32], strides = [1, 1]} : vector<8x64xf32> to vector<8x32xf32>
    %354 = vector.extract_strided_slice %345 {offsets = [0, 64], sizes = [8, 32], strides = [1, 1]} : vector<8x128xf32> to vector<8x32xf32>
    %355 = math.tanh %354 : vector<8x32xf32>
    %356 = vector.extract_strided_slice %345 {offsets = [0, 96], sizes = [8, 32], strides = [1, 1]} : vector<8x128xf32> to vector<8x32xf32>
    %357 = arith.negf %356 : vector<8x32xf32>
    %358 = math.exp %357 : vector<8x32xf32>
    %cst_80 = arith.constant 1.000000e+00 : f32
    %359 = vector.broadcast %cst_80 : f32 to vector<8x32xf32>
    %360 = arith.addf %359, %358 : vector<8x32xf32>
    %361 = arith.divf %359, %360 : vector<8x32xf32>
    %362 = arith.mulf %353, %339 : vector<8x32xf32>
    %363 = arith.mulf %352, %355 : vector<8x32xf32>
    %364 = arith.addf %362, %363 : vector<8x32xf32>
    %365 = math.tanh %364 : vector<8x32xf32>
    %366 = arith.mulf %361, %365 : vector<8x32xf32>
    %c40_81 = arith.constant 40 : index
    %c0_82 = arith.constant 0 : index
    %367 = vector.load %arg10[%c40_81, %c0_82] : memref<64x32xf32, #tpu.memory_space<vmem>>, vector<8x32xf32>
    tpu.vector_store %arg10[%c40_81, %c0_82], %366 {strides = array<i32>} : memref<64x32xf32, #tpu.memory_space<vmem>>, vector<8x32xf32>,
    %368 = vector.extract_strided_slice %215 {offsets = [48, 0], sizes = [8, 128], strides = [1, 1]} : vector<64x128xf32> to vector<8x128xf32>
    %cst_83 = arith.constant dense<0.000000e+00> : vector<8x128xf32>
    %369 = tpu.matmul %366, %211, %cst_83 {dimension_numbers = #tpu.dot_dimension_numbers<[1], [0], [0], [1], [0, 0, 1, 1], [], []>} : vector<8x32xf32>, vector<32x128xf32>, vector<8x128xf32> -> vector<8x128xf32>
    %370 = arith.addf %368, %369 : vector<8x128xf32>
    %371 = vector.extract_strided_slice %370 {offsets = [0, 0], sizes = [8, 64], strides = [1, 1]} : vector<8x128xf32> to vector<8x64xf32>
    %372 = arith.negf %371 : vector<8x64xf32>
    %373 = math.exp %372 : vector<8x64xf32>
    %cst_84 = arith.constant 1.000000e+00 : f32
    %374 = vector.broadcast %cst_84 : f32 to vector<8x64xf32>
    %375 = arith.addf %374, %373 : vector<8x64xf32>
    %376 = arith.divf %374, %375 : vector<8x64xf32>
    %377 = vector.extract_strided_slice %376 {offsets = [0, 0], sizes = [8, 32], strides = [1, 1]} : vector<8x64xf32> to vector<8x32xf32>
    %378 = vector.extract_strided_slice %376 {offsets = [0, 32], sizes = [8, 32], strides = [1, 1]} : vector<8x64xf32> to vector<8x32xf32>
    %379 = vector.extract_strided_slice %370 {offsets = [0, 64], sizes = [8, 32], strides = [1, 1]} : vector<8x128xf32> to vector<8x32xf32>
    %380 = math.tanh %379 : vector<8x32xf32>
    %381 = vector.extract_strided_slice %370 {offsets = [0, 96], sizes = [8, 32], strides = [1, 1]} : vector<8x128xf32> to vector<8x32xf32>
    %382 = arith.negf %381 : vector<8x32xf32>
    %383 = math.exp %382 : vector<8x32xf32>
    %cst_85 = arith.constant 1.000000e+00 : f32
    %384 = vector.broadcast %cst_85 : f32 to vector<8x32xf32>
    %385 = arith.addf %384, %383 : vector<8x32xf32>
    %386 = arith.divf %384, %385 : vector<8x32xf32>
    %387 = arith.mulf %378, %364 : vector<8x32xf32>
    %388 = arith.mulf %377, %380 : vector<8x32xf32>
    %389 = arith.addf %387, %388 : vector<8x32xf32>
    %390 = math.tanh %389 : vector<8x32xf32>
    %391 = arith.mulf %386, %390 : vector<8x32xf32>
    %c48_86 = arith.constant 48 : index
    %c0_87 = arith.constant 0 : index
    %392 = vector.load %arg10[%c48_86, %c0_87] : memref<64x32xf32, #tpu.memory_space<vmem>>, vector<8x32xf32>
    tpu.vector_store %arg10[%c48_86, %c0_87], %391 {strides = array<i32>} : memref<64x32xf32, #tpu.memory_space<vmem>>, vector<8x32xf32>,
    %393 = vector.extract_strided_slice %215 {offsets = [56, 0], sizes = [8, 128], strides = [1, 1]} : vector<64x128xf32> to vector<8x128xf32>
    %cst_88 = arith.constant dense<0.000000e+00> : vector<8x128xf32>
    %394 = tpu.matmul %391, %211, %cst_88 {dimension_numbers = #tpu.dot_dimension_numbers<[1], [0], [0], [1], [0, 0, 1, 1], [], []>} : vector<8x32xf32>, vector<32x128xf32>, vector<8x128xf32> -> vector<8x128xf32>
    %395 = arith.addf %393, %394 : vector<8x128xf32>
    %396 = vector.extract_strided_slice %395 {offsets = [0, 0], sizes = [8, 64], strides = [1, 1]} : vector<8x128xf32> to vector<8x64xf32>
    %397 = arith.negf %396 : vector<8x64xf32>
    %398 = math.exp %397 : vector<8x64xf32>
    %cst_89 = arith.constant 1.000000e+00 : f32
    %399 = vector.broadcast %cst_89 : f32 to vector<8x64xf32>
    %400 = arith.addf %399, %398 : vector<8x64xf32>
    %401 = arith.divf %399, %400 : vector<8x64xf32>
    %402 = vector.extract_strided_slice %401 {offsets = [0, 0], sizes = [8, 32], strides = [1, 1]} : vector<8x64xf32> to vector<8x32xf32>
    %403 = vector.extract_strided_slice %401 {offsets = [0, 32], sizes = [8, 32], strides = [1, 1]} : vector<8x64xf32> to vector<8x32xf32>
    %404 = vector.extract_strided_slice %395 {offsets = [0, 64], sizes = [8, 32], strides = [1, 1]} : vector<8x128xf32> to vector<8x32xf32>
    %405 = math.tanh %404 : vector<8x32xf32>
    %406 = vector.extract_strided_slice %395 {offsets = [0, 96], sizes = [8, 32], strides = [1, 1]} : vector<8x128xf32> to vector<8x32xf32>
    %407 = arith.negf %406 : vector<8x32xf32>
    %408 = math.exp %407 : vector<8x32xf32>
    %cst_90 = arith.constant 1.000000e+00 : f32
    %409 = vector.broadcast %cst_90 : f32 to vector<8x32xf32>
    %410 = arith.addf %409, %408 : vector<8x32xf32>
    %411 = arith.divf %409, %410 : vector<8x32xf32>
    %412 = arith.mulf %403, %389 : vector<8x32xf32>
    %413 = arith.mulf %402, %405 : vector<8x32xf32>
    %414 = arith.addf %412, %413 : vector<8x32xf32>
    %415 = math.tanh %414 : vector<8x32xf32>
    %416 = arith.mulf %411, %415 : vector<8x32xf32>
    %c56_91 = arith.constant 56 : index
    %c0_92 = arith.constant 0 : index
    %417 = vector.load %arg10[%c56_91, %c0_92] : memref<64x32xf32, #tpu.memory_space<vmem>>, vector<8x32xf32>
    tpu.vector_store %arg10[%c56_91, %c0_92], %416 {strides = array<i32>} : memref<64x32xf32, #tpu.memory_space<vmem>>, vector<8x32xf32>,
    %c0_93 = arith.constant 0 : index
    %c0_94 = arith.constant 0 : index
    %418 = vector.load %arg10[%c0_93, %c0_94] : memref<64x32xf32, #tpu.memory_space<vmem>>, vector<64x32xf32>
    %c0_95 = arith.constant 0 : index
    %c0_96 = arith.constant 0 : index
    %419 = vector.load %arg7[%c0_95, %c0_96] : memref<32x128xf32, #tpu.memory_space<vmem>>, vector<32x128xf32>
    %cst_97 = arith.constant dense<0.000000e+00> : vector<64x128xf32>
    %420 = tpu.matmul %418, %419, %cst_97 {dimension_numbers = #tpu.dot_dimension_numbers<[1], [0], [0], [1], [0, 0, 1, 1], [], []>} : vector<64x32xf32>, vector<32x128xf32>, vector<64x128xf32> -> vector<64x128xf32>
    %c0_98 = arith.constant 0 : index
    %c0_99 = arith.constant 0 : index
    %421 = vector.load %arg8[%c0_98, %c0_99] : memref<1x128xf32, #tpu.memory_space<vmem>>, vector<1x128xf32>
    %422 = vector.broadcast %421 : vector<1x128xf32> to vector<64x128xf32>
    %423 = arith.addf %420, %422 : vector<64x128xf32>
    %cst_100 = arith.constant dense<0xFF800000> : vector<64xf32>
    %424 = vector.multi_reduction <maximumf>, %423, %cst_100 [1] : vector<64x128xf32> to vector<64xf32>
    %425 = vector.shape_cast %424 : vector<64xf32> to vector<64x1xf32>
    %426 = vector.broadcast %425 : vector<64x1xf32> to vector<64x128xf32>
    %427 = arith.subf %423, %426 : vector<64x128xf32>
    %428 = math.exp %427 : vector<64x128xf32>
    %cst_101 = arith.constant dense<0.000000e+00> : vector<64xf32>
    %429 = vector.multi_reduction <add>, %428, %cst_101 [1] : vector<64x128xf32> to vector<64xf32>
    %430 = vector.shape_cast %429 : vector<64xf32> to vector<64x1xf32>
    %431 = math.log %430 : vector<64x1xf32>
    %432 = vector.broadcast %431 : vector<64x1xf32> to vector<64x128xf32>
    %433 = arith.subf %427, %432 : vector<64x128xf32>
    %c0_102 = arith.constant 0 : index
    %c0_103 = arith.constant 0 : index
    %434 = vector.load %arg9[%c0_102, %c0_103] : memref<64x128xf32, #tpu.memory_space<vmem>>, vector<64x128xf32>
    tpu.vector_store %arg9[%c0_102, %c0_103], %433 {strides = array<i32>} : memref<64x128xf32, #tpu.memory_space<vmem>>, vector<64x128xf32>,
    return
  }
}

</mosaic_0001>

<bundles_post_ra>
// kernel: lstm_lm_forward.1
= control target key start
LH: loop header
LB: loop body
LE: loop exit
PB: predicated region body
PF: predicated region fallthrough
CT: control target
= control target key end

     0   :  { %vm55_vm0 = vcmask 261120   ;;  %v2906_v13 = vmov 0.0|0.0   ;;  %vm2907_vm1 = vmmov 0   ;;  %v2908_v19 = vmov 0.0   ;;  %s2909_s16 = smov 64   ;;  %s3386_s1 = inlined_call_operand.vmem [shape: f32[32,128], index: 1, kind: input, shape index: {}]   ;;  %s3387_s0 = inlined_call_operand.vmem [shape: f32[64,32], index: 0, kind: input, shape index: {}]   ;;  %s3388_s2 = inlined_call_operand.vmem [shape: f32[32,128], index: 2, kind: input, shape index: {}]   ;;  %s3389_s3 = inlined_call_operand.vmem [shape: f32[1,128], index: 3, kind: input, shape index: {}]   ;;  %s3390_s4 = inlined_call_operand.vmem [shape: f32[32,128], index: 4, kind: input, shape index: {}]   ;;  %s3391_s5 = inlined_call_operand.vmem [shape: f32[32,128], index: 5, kind: input, shape index: {}]   ;;  %s3392_s6 = inlined_call_operand.vmem [shape: f32[1,128], index: 6, kind: input, shape index: {}]   ;;  %s3393_s7 = inlined_call_operand.vmem [shape: f32[32,128], index: 7, kind: input, shape index: {}]   ;;  %s3394_s8 = inlined_call_operand.vmem [shape: f32[1,128], index: 8, kind: input, shape index: {}]   ;;  %s3395_s9 = inlined_call_operand.vmem [shape: f32[64,128], index: 9, kind: output, shape index: {}]  }
   0x1   :  { %v40_v0 = vld [vmem:[%s3386_s1] sm:$0xff]  ;;  %v41_v1 = vld [vmem:[%s3386_s1 + $0x8] sm:$0xff]  ;;  %v42_v2 = vld [vmem:[%s3386_s1 + $0x10] sm:$0xff] }
   0x2   :  { %v2617_v3 = vpack.c.bf16 %v41_v1, %v40_v0  ;;  %v43_v4 = vld [vmem:[%s3386_s1 + $0x18] sm:$0xff]  ;;  %v36_v5 = vld [vmem:[%s3387_s0 + $0x20] sm:$0xff]  ;;  %v45_v9 = vld [vmem:[%s3388_s2 + $0x8] sm:$0xff] }
   0x3   :  { %v2621_v6 = vpack.c.bf16 %v43_v4, %v42_v2  ;;  %2395 = vmatprep.mubr.msk.f32.mxu1 %vm55_vm0, %v36_v5  ;;  %v32_v7 = vld [vmem:[%s3387_s0] sm:$0xff]  ;;  %v37_v10 = vld [vmem:[%s3387_s0 + $0x28] sm:$0xff]  ;;  %v38_v14 = vld [vmem:[%s3387_s0 + $0x30] sm:$0xff] }
   0x4   :  { %2737 = vmatprep.subr.bf16.mxu1 %v2617_v3  ;;  %2618 = vmatprep.subr.bf16.mxu0 %v2617_v3  ;;  %v44_v8 = vld [vmem:[%s3388_s2] sm:$0xff]  ;;  %v33_v12 = vld [vmem:[%s3387_s0 + $0x8] sm:$0xff]  ;;  %v46_v15 = vld [vmem:[%s3388_s2 + $0x10] sm:$0xff] }
   0x5   :  { %2739 = vmatpush3.bf16.msra.mxu1 %v2617_v3  ;;  %2620 = vmatpush3.bf16.msra.mxu0 %v2617_v3  ;;  %v2990_v11 = vpack.c.bf16 %v45_v9, %v44_v8  ;;  %v47_v16 = vld [vmem:[%s3388_s2 + $0x18] sm:$0xff]  ;;  %v3039_v24 = vld [vmem:[%s3389_s3] ss:$0 sm:$0xff]  ;;  %s2910_s3 = smov 32   ;;  %v34_v59 = vld [vmem:[%s3387_s0 + $0x10] sm:$0xff] }
   0x6   :  { %2738 = vmatprep.subr.bf16.mxu1 %v2621_v6  ;;  %2622 = vmatprep.subr.bf16.mxu0 %v2621_v6  ;;  %v39_v17 = vld [vmem:[%s3387_s0 + $0x38] sm:$0xff]  ;;  %v3013_v18 = vpack.c.bf16 %v47_v16, %v46_v15 }
   0x7   :  { %2389 = vmatprep.mubr.msk.f32.mxu0 %vm55_vm0, %v32_v7  ;;  %v35_v60 = vld [vmem:[%s3387_s0 + $0x18] sm:$0xff] }
   0x9   :  { %2740 = vmatpush3.bf16.msra.mxu1 %v2621_v6  ;;  %2624 = vmatpush3.bf16.msra.mxu0 %v2621_v6 }
   0xa   :  { %2625 = vmatprep.subr.bf16.mxu1 %v2906_v13  ;;  %2637 = vmatprep.subr.bf16.mxu0 %v2906_v13 }
   0xc   :  { %2396 = vmatmul.mubr.msk.f32.vlgmr.msra.gmra.mrb[0].mxu1 %vm55_vm0, %v37_v10  ;;  %2390 = vmatmul.mubr.msk.f32.vlgmr.msra.gmra.mrb[0].mxu0 %vm55_vm0, %v33_v12 }
   0xd   :  { %2627 = vmatpush3.bf16.msra.mxu1 %v2990_v11  ;;  %2398 = vmatprep.mubr.msk.f32.mxu1 %vm55_vm0, %v38_v14 }
   0xe   :  { %2628 = vmatprep.subr.bf16.mxu1 %v2906_v13  ;;  %2639 = vmatpush3.bf16.msra.mxu0 %v2990_v11 }
   0xf   :  { %2640 = vmatprep.subr.bf16.mxu0 %v2906_v13  ;;  %2392 = vmatprep.mubr.msk.f32.mxu0 %vm55_vm0, %v34_v59 }
  0x10   :  { %2399 = vmatmul.mubr.msk.f32.gmra.mrb[2].mxu1 %vm55_vm0, %v39_v17  ;;  %2393 = vmatmul.mubr.msk.f32.gmra.mrb[2].mxu0 %vm55_vm0, %v35_v60 }
  0x11   :  { %2630 = vmatpush3.bf16.msra.mxu1 %v3013_v18  ;;  %2409 = vmatprep.mubr.msk.f32.mxu1 %vm2907_vm1, %v2908_v19 }
  0x12   :  { %2631 = vmatprep.subr.bf16.mxu1 %v2906_v13  ;;  %2642 = vmatpush3.bf16.msra.mxu0 %v3013_v18 }
  0x13   :  { %2649 = vmatprep.subr.bf16.mxu0 %v2906_v13  ;;  %2431 = vmatprep.mubr.msk.f32.mxu0 %vm2907_vm1, %v2908_v19 }
  0x14   :  { %2410 = vmatmul.mubr.f32.vlgmr.msra.gmra.mrb[4].mxu1 %v2908_v19 }
  0x15   :  { %2633 = vmatpush3.bf16.msra.mxu1 %v2990_v11  ;;  %2420 = vmatprep.mubr.msk.f32.mxu1 %vm2907_vm1, %v2908_v19 }
  0x16   :  { %2634 = vmatprep.subr.bf16.mxu1 %v2906_v13 }
  0x19   :  { %2636 = vmatpush3.bf16.msra.mxu1 %v3013_v18 }
  0x1a   :  { %2643 = vmatprep.subr.bf16.mxu1 %v2906_v13 }
  0xdf   :  { %v3032_v20 = vpop.f32.mrb[0].mxu1  ;;  %v2391_v21 = vpop.f32.mrb[0].mxu0 }
  0xe0   :  { %v3034_v22 = vpop.f32.mrb[1].mxu1  ;;  %v146_v23 = vpop.f32.mrb[1].mxu0  ;;  %v152_v45 = vadd.f32 %v2391_v21, %v3039_v24 }
  0xe1   :  { %v147_v27 = vadd.f32 %v3039_v24, %v146_v23 }
  0xe3   :  { %v3041_v25 = vpop.f32.mrb[2].mxu1  ;;  %v2394_v0 = vpop.f32.mrb[2].mxu0 }
  0xe4   :  { %v3043_v26 = vpop.f32.mrb[3].mxu1  ;;  %v156_v1 = vpop.f32.mrb[3].mxu0 }
  0xe5   :  { %v157_v3 = vadd.f32 %v3039_v24, %v156_v1  ;;  %v172_v1 = vadd.f32 %v3032_v20, %v3039_v24 }
  0xe7   :  { %v254_v28 = vpop.f32.mrb[4].mxu1 }
  0xe8   :  { %v258_v29 = vadd.f32 %v254_v28, %v147_v27  ;;  %v2411_v30 = vpop.f32.mrb[5].mxu1 }
  0xe9   :  { %v162_v30 = vadd.f32 %v2394_v0, %v3039_v24 }
  0xea   :  { %2746 = vtanh.f32 %v258_v29  ;;  %v2217_v32 = vmul.f32 -1.442695, %v258_v29 }
  0xec   :  { %2748 = vpow2.f32 %v2217_v32 }
  0xf4   :  { %v2747_v31 = vpop.eup %2746 }
  0xf5   :  { %268 = vrot.lane.b32.xlu0 %v2747_v31, %s2909_s16 }
  0xf6   :  { %v2749_v33 = vpop.eup %2748 }
  0xf7   :  { %v262_v34 = vadd.f32 1.0, %v2749_v33 }
  0xf9   :  { %2750 = vrcp.f32 %v262_v34 }
 0x103   :  { %v2751_v35 = vpop.eup %2750 }
 0x104   :  { %v266_v38 = vmul.f32 0.0, %v2751_v35 }
 0x167   :  { %v269_v36 = vpop.permute.xlu0 %268 }
 0x168   :  { %v271_v37 = vmul.f32 %v2751_v35, %v269_v36 }
 0x16a   :  { %273 = vrot.lane.b32.xlu0 %v271_v37, %s2910_s3 }
 0x1dc   :  { %v274_v39 = vpop.permute.xlu0 %273 }
 0x1dd   :  { %v276_v40 = vadd.f32 %v274_v39, %v266_v38 }
 0x1df   :  { %2752 = vtanh.f32 %v276_v40 }
 0x1e9   :  { %v2753_v41 = vpop.eup %2752 }
 0x1ea   :  { %279 = vrot.lane.b32.xlu1 %v2753_v41, %s2909_s16 }
 0x25c   :  { %v280_v42 = vpop.permute.xlu1 %279 }
 0x25d   :  { %v282_v43 = vmul.f32 %v2751_v35, %v280_v42 }
 0x25f   :  { %284 = vrot.lane.b32.xlu1 %v282_v43, %s2910_s3 }
 0x2d1   :  { %v285_v44 = vpop.permute.xlu1 %284 }
 0x2d2   :  { %287 = vst.msk [vmem:[#allocation2] sm:$0xff] %vm55_vm0, %v285_v44  ;;  %2421 = vmatmul.mubr.msk.f32.vlgmr.msra.gmra.mrb[6].mxu1 %vm55_vm0, %v285_v44 }
 0x2d3   :  { %2645 = vmatpush3.bf16.msra.mxu1 %v2990_v11  ;;  %2442 = vmatprep.mubr.msk.f32.mxu1 %vm2907_vm1, %v2908_v19 }
 0x2d4   :  { %2646 = vmatprep.subr.bf16.mxu1 %v2906_v13 }
 0x2d7   :  { %2648 = vmatpush3.bf16.msra.mxu1 %v3013_v18 }
 0x2d8   :  { %2655 = vmatprep.subr.bf16.mxu1 %v2906_v13 }
 0x3a5   :  { %v356_v46 = vpop.f32.mrb[6].mxu1 }
 0x3a6   :  { %v360_v47 = vadd.f32 %v356_v46, %v152_v45  ;;  %v2422_v48 = vpop.f32.mrb[7].mxu1 }
 0x3a7   :  { %v167_v48 = vadd.f32 %v3039_v24, %v3034_v22 }
 0x3a8   :  { %2754 = vtanh.f32 %v360_v47  ;;  %v2219_v50 = vmul.f32 -1.442695, %v360_v47 }
 0x3aa   :  { %2756 = vpow2.f32 %v2219_v50 }
 0x3b2   :  { %v2755_v49 = vpop.eup %2754 }
 0x3b3   :  { %370 = vrot.lane.b32.xlu0 %v2755_v49, %s2909_s16 }
 0x3b4   :  { %v2757_v51 = vpop.eup %2756 }
 0x3b5   :  { %v364_v52 = vadd.f32 1.0, %v2757_v51 }
 0x3b7   :  { %2758 = vrcp.f32 %v364_v52 }
 0x3c1   :  { %v2759_v53 = vpop.eup %2758 }
 0x3c2   :  { %v368_v56 = vmul.f32 %v2759_v53, %v276_v40 }
 0x425   :  { %v371_v54 = vpop.permute.xlu0 %370 }
 0x426   :  { %v373_v55 = vmul.f32 %v2759_v53, %v371_v54 }
 0x428   :  { %375 = vrot.lane.b32.xlu1 %v373_v55, %s2910_s3 }
 0x49a   :  { %v376_v57 = vpop.permute.xlu1 %375 }
 0x49b   :  { %v378_v58 = vadd.f32 %v376_v57, %v368_v56 }
 0x49d   :  { %2760 = vtanh.f32 %v378_v58 }
 0x4a7   :  { %v2761_v61 = vpop.eup %2760 }
 0x4a8   :  { %381 = vrot.lane.b32.xlu0 %v2761_v61, %s2909_s16 }
 0x51a   :  { %v382_v62 = vpop.permute.xlu0 %381 }
 0x51b   :  { %v384_v63 = vmul.f32 %v2759_v53, %v382_v62 }
 0x51d   :  { %386 = vrot.lane.b32.xlu1 %v384_v63, %s2910_s3 }
 0x58f   :  { %v387_v2 = vpop.permute.xlu1 %386 }
 0x590   :  { %389 = vst.msk [vmem:[#allocation2 + $0x8] sm:$0xff] %vm55_vm0, %v387_v2  ;;  %2432 = vmatmul.mubr.msk.f32.vlgmr.msra.gmra.mrb[4].mxu0 %vm55_vm0, %v387_v2 }
 0x591   :  { %2651 = vmatpush3.bf16.msra.mxu0 %v2990_v11  ;;  %2453 = vmatprep.mubr.msk.f32.mxu0 %vm2907_vm1, %v2908_v19 }
 0x592   :  { %2652 = vmatprep.subr.bf16.mxu0 %v2906_v13 }
 0x595   :  { %2654 = vmatpush3.bf16.msra.mxu0 %v3013_v18 }
 0x596   :  { %2661 = vmatprep.subr.bf16.mxu0 %v2906_v13 }
 0x663   :  { %v458_v4 = vpop.f32.mrb[4].mxu0 }
 0x664   :  { %v462_v5 = vadd.f32 %v458_v4, %v157_v3  ;;  %v2433_v6 = vpop.f32.mrb[5].mxu0 }
 0x666   :  { %2762 = vtanh.f32 %v462_v5  ;;  %v2221_v8 = vmul.f32 -1.442695, %v462_v5 }
 0x668   :  { %2764 = vpow2.f32 %v2221_v8 }
 0x670   :  { %v2763_v7 = vpop.eup %2762 }
 0x671   :  { %472 = vrot.lane.b32.xlu0 %v2763_v7, %s2909_s16 }
 0x672   :  { %v2765_v9 = vpop.eup %2764 }
 0x673   :  { %v466_v10 = vadd.f32 1.0, %v2765_v9 }
 0x675   :  { %2766 = vrcp.f32 %v466_v10 }
 0x67f   :  { %v2767_v12 = vpop.eup %2766 }
 0x680   :  { %v470_v16 = vmul.f32 %v2767_v12, %v378_v58 }
 0x6e3   :  { %v473_v14 = vpop.permute.xlu0 %472 }
 0x6e4   :  { %v475_v15 = vmul.f32 %v2767_v12, %v473_v14  ;;  %v1010_v14 = vld [vmem:[%s3390_s4] sm:$0xff] }
 0x6e6   :  { %477 = vrot.lane.b32.xlu1 %v475_v15, %s2910_s3  ;;  %v1011_v15 = vld [vmem:[%s3390_s4 + $0x8] sm:$0xff] }
 0x758   :  { %v478_v17 = vpop.permute.xlu1 %477 }
 0x759   :  { %v480_v21 = vadd.f32 %v478_v17, %v470_v16  ;;  %v2673_v16 = vpack.c.bf16 %v1011_v15, %v1010_v14 }
 0x75b   :  { %2768 = vtanh.f32 %v480_v21 }
 0x765   :  { %v2769_v23 = vpop.eup %2768 }
 0x766   :  { %483 = vrot.lane.b32.xlu0 %v2769_v23, %s2909_s16 }
 0x7d8   :  { %v484_v27 = vpop.permute.xlu0 %483 }
 0x7d9   :  { %v486_v28 = vmul.f32 %v2767_v12, %v484_v27  ;;  %v1012_v27 = vld [vmem:[%s3390_s4 + $0x10] sm:$0xff] }
 0x7db   :  { %488 = vrot.lane.b32.xlu1 %v486_v28, %s2910_s3  ;;  %v1013_v28 = vld [vmem:[%s3390_s4 + $0x18] sm:$0xff] }
 0x84d   :  { %v489_v29 = vpop.permute.xlu1 %488 }
 0x84e   :  { %491 = vst.msk [vmem:[#allocation2 + $0x10] sm:$0xff] %vm55_vm0, %v489_v29  ;;  %2443 = vmatmul.mubr.msk.f32.vlgmr.msra.gmra.mrb[8].mxu1 %vm55_vm0, %v489_v29  ;;  %v2677_v29 = vpack.c.bf16 %v1013_v28, %v1012_v27 }
 0x84f   :  { %2657 = vmatpush3.bf16.msra.mxu1 %v2990_v11  ;;  %2464 = vmatprep.mubr.msk.f32.mxu1 %vm2907_vm1, %v2908_v19 }
 0x850   :  { %2658 = vmatprep.subr.bf16.mxu1 %v2906_v13 }
 0x853   :  { %2660 = vmatpush3.bf16.msra.mxu1 %v3013_v18 }
 0x854   :  { %2667 = vmatprep.subr.bf16.mxu1 %v2906_v13 }
 0x921   :  { %v560_v31 = vpop.f32.mrb[8].mxu1 }
 0x922   :  { %v564_v32 = vadd.f32 %v560_v31, %v162_v30  ;;  %v2444_v33 = vpop.f32.mrb[9].mxu1  ;;  %v1002_v31 = vld [vmem:[#allocation2] sm:$0xff] }
 0x923   :  { %v1004_v33 = vld [vmem:[#allocation2 + $0x10] sm:$0xff] }
 0x924   :  { %2770 = vtanh.f32 %v564_v32  ;;  %v2223_v35 = vmul.f32 -1.442695, %v564_v32  ;;  %v1003_v32 = vld [vmem:[#allocation2 + $0x8] sm:$0xff] }
 0x926   :  { %2772 = vpow2.f32 %v2223_v35 }
 0x92e   :  { %v2771_v34 = vpop.eup %2770 }
 0x92f   :  { %574 = vrot.lane.b32.xlu0 %v2771_v34, %s2909_s16 }
 0x930   :  { %v2773_v36 = vpop.eup %2772 }
 0x931   :  { %v568_v37 = vadd.f32 1.0, %v2773_v36 }
 0x933   :  { %2774 = vrcp.f32 %v568_v37  ;;  %v177_v37 = vadd.f32 %v3039_v24, %v3043_v26 }
 0x93d   :  { %v2775_v38 = vpop.eup %2774 }
 0x93e   :  { %v572_v41 = vmul.f32 %v2775_v38, %v480_v21 }
 0x9a1   :  { %v575_v39 = vpop.permute.xlu0 %574 }
 0x9a2   :  { %v577_v40 = vmul.f32 %v2775_v38, %v575_v39 }
 0x9a4   :  { %579 = vrot.lane.b32.xlu1 %v577_v40, %s2910_s3 }
 0xa16   :  { %v580_v42 = vpop.permute.xlu1 %579 }
 0xa17   :  { %v582_v43 = vadd.f32 %v580_v42, %v572_v41 }
 0xa19   :  { %2776 = vtanh.f32 %v582_v43 }
 0xa23   :  { %v2777_v44 = vpop.eup %2776 }
 0xa24   :  { %585 = vrot.lane.b32.xlu0 %v2777_v44, %s2909_s16 }
 0xa96   :  { %v586_v45 = vpop.permute.xlu0 %585 }
 0xa97   :  { %v588_v46 = vmul.f32 %v2775_v38, %v586_v45 }
 0xa99   :  { %590 = vrot.lane.b32.xlu1 %v588_v46, %s2910_s3 }
 0xb0b   :  { %v591_v47 = vpop.permute.xlu1 %590 }
 0xb0c   :  { %593 = vst.msk [vmem:[#allocation2 + $0x18] sm:$0xff] %vm55_vm0, %v591_v47  ;;  %2454 = vmatmul.mubr.msk.f32.vlgmr.msra.gmra.mrb[6].mxu0 %vm55_vm0, %v591_v47 }
 0xb0d   :  { %2663 = vmatpush3.bf16.msra.mxu0 %v2990_v11  ;;  %2475 = vmatprep.mubr.msk.f32.mxu0 %vm2907_vm1, %v2908_v19 }
 0xb0e   :  { %2664 = vmatprep.subr.bf16.mxu0 %v2906_v13 }
 0xb11   :  { %2666 = vmatpush3.bf16.msra.mxu0 %v3013_v18 }
 0xb12   :  { %2674 = vmatprep.subr.bf16.mxu0 %v2673_v16 }
 0xb13   :  { %v1005_v34 = vld [vmem:[#allocation2 + $0x18] sm:$0xff] }
 0xbdf   :  { %v662_v49 = vpop.f32.mrb[6].mxu0 }
 0xbe0   :  { %v666_v50 = vadd.f32 %v662_v49, %v167_v48  ;;  %v2455_v51 = vpop.f32.mrb[7].mxu0 }
 0xbe2   :  { %2778 = vtanh.f32 %v666_v50  ;;  %v2225_v53 = vmul.f32 -1.442695, %v666_v50 }
 0xbe4   :  { %2780 = vpow2.f32 %v2225_v53 }
 0xbec   :  { %v2779_v52 = vpop.eup %2778 }
 0xbed   :  { %676 = vrot.lane.b32.xlu0 %v2779_v52, %s2909_s16 }
 0xbee   :  { %v2781_v54 = vpop.eup %2780 }
 0xbef   :  { %v670_v55 = vadd.f32 1.0, %v2781_v54 }
 0xbf1   :  { %2782 = vrcp.f32 %v670_v55 }
 0xbfb   :  { %v2783_v56 = vpop.eup %2782 }
 0xbfc   :  { %v674_v59 = vmul.f32 %v2783_v56, %v582_v43 }
 0xc5f   :  { %v677_v57 = vpop.permute.xlu0 %676 }
 0xc60   :  { %v679_v58 = vmul.f32 %v2783_v56, %v677_v57  ;;  %v1014_v57 = vld [vmem:[%s3391_s5] sm:$0xff] }
 0xc62   :  { %681 = vrot.lane.b32.xlu1 %v679_v58, %s2910_s3  ;;  %v1015_v58 = vld [vmem:[%s3391_s5 + $0x8] sm:$0xff] }
 0xcd4   :  { %v682_v60 = vpop.permute.xlu1 %681 }
 0xcd5   :  { %v684_v22 = vadd.f32 %v682_v60, %v674_v59  ;;  %v3171_v59 = vpack.c.bf16 %v1015_v58, %v1014_v57  ;;  %v1016_v60 = vld [vmem:[%s3391_s5 + $0x10] sm:$0xff] }
 0xcd7   :  { %2784 = vtanh.f32 %v684_v22 }
 0xce1   :  { %v2785_v61 = vpop.eup %2784 }
 0xce2   :  { %687 = vrot.lane.b32.xlu0 %v2785_v61, %s2909_s16 }
 0xd54   :  { %v688_v62 = vpop.permute.xlu0 %687 }
 0xd55   :  { %v690_v63 = vmul.f32 %v2783_v56, %v688_v62 }
 0xd57   :  { %692 = vrot.lane.b32.xlu1 %v690_v63, %s2910_s3 }
 0xdc9   :  { %v693_v0 = vpop.permute.xlu1 %692 }
 0xdca   :  { %695 = vst.msk [vmem:[#allocation2 + $0x20] sm:$0xff] %vm55_vm0, %v693_v0  ;;  %2465 = vmatmul.mubr.msk.f32.vlgmr.msra.gmra.mrb[10].mxu1 %vm55_vm0, %v693_v0 }
 0xdcb   :  { %2669 = vmatpush3.bf16.msra.mxu1 %v2990_v11  ;;  %2486 = vmatprep.mubr.msk.f32.mxu1 %vm2907_vm1, %v2908_v19 }
 0xdcc   :  { %2670 = vmatprep.subr.bf16.mxu1 %v2906_v13 }
 0xdcf   :  { %2672 = vmatpush3.bf16.msra.mxu1 %v3013_v18 }
 0xdd0   :  { %2681 = vmatprep.subr.bf16.mxu1 %v2906_v13 }
 0xdd1   :  { %v1006_v35 = vld [vmem:[#allocation2 + $0x20] sm:$0xff] }
 0xe9d   :  { %v764_v2 = vpop.f32.mrb[10].mxu1 }
 0xe9e   :  { %v768_v3 = vadd.f32 %v764_v2, %v172_v1  ;;  %v2466_v4 = vpop.f32.mrb[11].mxu1  ;;  %v182_v2 = vadd.f32 %v3041_v25, %v3039_v24 }
 0xea0   :  { %2786 = vtanh.f32 %v768_v3  ;;  %v2227_v11 = vmul.f32 -1.442695, %v768_v3 }
 0xea2   :  { %2788 = vpow2.f32 %v2227_v11  ;;  %v3207_v11 = vld [vmem:[%s3392_s6] ss:$0 sm:$0xff] }
 0xeaa   :  { %v2787_v5 = vpop.eup %2786 }
 0xeab   :  { %778 = vrot.lane.b32.xlu0 %v2787_v5, %s2909_s16 }
 0xeac   :  { %v2789_v6 = vpop.eup %2788 }
 0xead   :  { %v772_v7 = vadd.f32 1.0, %v2789_v6 }
 0xeaf   :  { %2790 = vrcp.f32 %v772_v7 }
 0xeb9   :  { %v2791_v8 = vpop.eup %2790 }
 0xeba   :  { %v776_v10 = vmul.f32 %v2791_v8, %v684_v22  ;;  %v1017_v22 = vld [vmem:[%s3391_s5 + $0x18] sm:$0xff] }
 0xebb   :  { %v3181_v61 = vpack.c.bf16 %v1017_v22, %v1016_v60 }
 0xf1d   :  { %v779_v9 = vpop.permute.xlu0 %778 }
 0xf1e   :  { %v781_v18 = vmul.f32 %v2791_v8, %v779_v9 }
 0xf20   :  { %783 = vrot.lane.b32.xlu1 %v781_v18, %s2910_s3 }
 0xf92   :  { %v784_v12 = vpop.permute.xlu1 %783 }
 0xf93   :  { %v786_v20 = vadd.f32 %v784_v12, %v776_v10 }
 0xf95   :  { %2792 = vtanh.f32 %v786_v20 }
 0xf9f   :  { %v2793_v17 = vpop.eup %2792 }
 0xfa0   :  { %789 = vrot.lane.b32.xlu0 %v2793_v17, %s2909_s16 }
0x1012   :  { %v790_v21 = vpop.permute.xlu0 %789 }
0x1013   :  { %v792_v23 = vmul.f32 %v2791_v8, %v790_v21 }
0x1015   :  { %794 = vrot.lane.b32.xlu1 %v792_v23, %s2910_s3 }
0x1087   :  { %v795_v30 = vpop.permute.xlu1 %794 }
0x1088   :  { %797 = vst.msk [vmem:[#allocation2 + $0x28] sm:$0xff] %vm55_vm0, %v795_v30  ;;  %2476 = vmatmul.mubr.msk.f32.vlgmr.msra.gmra.mrb[8].mxu0 %vm55_vm0, %v795_v30 }
0x1089   :  { %2676 = vmatpush3.bf16.msra.mxu0 %v2673_v16  ;;  %2497 = vmatprep.mubr.msk.f32.mxu0 %vm55_vm0, %v1002_v31 }
0x108a   :  { %2678 = vmatprep.subr.bf16.mxu0 %v2677_v29 }
0x108d   :  { %2680 = vmatpush3.bf16.msra.mxu0 %v2677_v29 }
0x108e   :  { %2693 = vmatprep.subr.bf16.mxu0 %v2906_v13 }
0x108f   :  { %v1007_v36 = vld [vmem:[#allocation2 + $0x28] sm:$0xff] }
0x1090   :  { %2498 = vmatmul.mubr.msk.f32.vlgmr.msra.gmra.mrb[10].mxu0 %vm55_vm0, %v1003_v32 }
0x1091   :  { %2500 = vmatprep.mubr.msk.f32.mxu0 %vm55_vm0, %v1004_v33  ;;  %2695 = vmatpush3.bf16.msra.mxu0 %v3171_v59 }
0x1092   :  { %2696 = vmatprep.subr.bf16.mxu0 %v2906_v13 }
0x1094   :  { %2501 = vmatmul.mubr.msk.f32.gmra.mrb[12].mxu0 %vm55_vm0, %v1005_v34 }
0x1095   :  { %2503 = vmatprep.mubr.msk.f32.mxu0 %vm55_vm0, %v1006_v35  ;;  %2698 = vmatpush3.bf16.msra.mxu0 %v3181_v61 }
0x1096   :  { %2705 = vmatprep.subr.bf16.mxu0 %v2906_v13 }
0x1098   :  { %2504 = vmatmul.mubr.msk.f32.gmra.mrb[14].mxu0 %vm55_vm0, %v1007_v36 }
0x115b   :  { %v866_v38 = vpop.f32.mrb[8].mxu0 }
0x115c   :  { %v870_v39 = vadd.f32 %v866_v38, %v177_v37  ;;  %v2477_v40 = vpop.f32.mrb[9].mxu0 }
0x115e   :  { %2794 = vtanh.f32 %v870_v39  ;;  %v2229_v48 = vmul.f32 -1.442695, %v870_v39 }
0x1160   :  { %2796 = vpow2.f32 %v2229_v48 }
0x1163   :  { %v3149_v41 = vpop.f32.mrb[10].mxu0 }
0x1164   :  { %v1115_v42 = vpop.f32.mrb[11].mxu0 }
0x1165   :  { %v1116_v6 = vadd.f32 %v3207_v11, %v1115_v42 }
0x1167   :  { %v3151_v43 = vpop.f32.mrb[12].mxu0 }
0x1168   :  { %v2795_v44 = vpop.eup %2794  ;;  %v3153_v45 = vpop.f32.mrb[13].mxu0 }
0x1169   :  { %880 = vrot.lane.b32.xlu0 %v2795_v44, %s2909_s16  ;;  %v1121_v44 = vadd.f32 %v3149_v41, %v3207_v11 }
0x116a   :  { %v2797_v26 = vpop.eup %2796 }
0x116b   :  { %v3156_v46 = vpop.f32.mrb[14].mxu0  ;;  %v874_v49 = vadd.f32 1.0, %v2797_v26 }
0x116c   :  { %v3158_v47 = vpop.f32.mrb[15].mxu0 }
0x116d   :  { %2798 = vrcp.f32 %v874_v49 }
0x1177   :  { %v2799_v50 = vpop.eup %2798 }
0x1178   :  { %v878_v53 = vmul.f32 %v2799_v50, %v786_v20 }
0x11db   :  { %v881_v51 = vpop.permute.xlu0 %880 }
0x11dc   :  { %v883_v52 = vmul.f32 %v2799_v50, %v881_v51 }
0x11de   :  { %885 = vrot.lane.b32.xlu1 %v883_v52, %s2910_s3 }
0x1250   :  { %v886_v54 = vpop.permute.xlu1 %885 }
0x1251   :  { %v3161_v55 = vadd.f32 %v886_v54, %v878_v53 }
0x1253   :  { %2800 = vtanh.f32 %v3161_v55 }
0x125d   :  { %v2801_v56 = vpop.eup %2800 }
0x125e   :  { %891 = vrot.lane.b32.xlu0 %v2801_v56, %s2909_s16 }
0x12d0   :  { %v892_v62 = vpop.permute.xlu0 %891 }
0x12d1   :  { %v894_v63 = vmul.f32 %v2799_v50, %v892_v62 }
0x12d3   :  { %896 = vrot.lane.b32.xlu1 %v894_v63, %s2910_s3 }
0x1345   :  { %v897_v0 = vpop.permute.xlu1 %896 }
0x1346   :  { %899 = vst.msk [vmem:[#allocation2 + $0x30] sm:$0xff] %vm55_vm0, %v897_v0  ;;  %2487 = vmatmul.mubr.msk.f32.vlgmr.msra.gmra.mrb[12].mxu1 %vm55_vm0, %v897_v0 }
0x1347   :  { %2683 = vmatpush3.bf16.msra.mxu1 %v3171_v59  ;;  %2517 = vmatprep.mubr.msk.f32.mxu1 %vm2907_vm1, %v2908_v19 }
0x1348   :  { %2684 = vmatprep.subr.bf16.mxu1 %v2906_v13 }
0x134b   :  { %2686 = vmatpush3.bf16.msra.mxu1 %v3181_v61 }
0x134c   :  { %2687 = vmatprep.subr.bf16.mxu1 %v2906_v13 }
0x134d   :  { %v1008_v1 = vld [vmem:[#allocation2 + $0x30] sm:$0xff] }
0x134e   :  { %2518 = vmatmul.mubr.f32.vlgmr.msra.gmra.mrb[14].mxu1 %v2908_v19  ;;  %2506 = vmatprep.mubr.msk.f32.mxu0 %vm55_vm0, %v1008_v1 }
0x134f   :  { %2689 = vmatpush3.bf16.msra.mxu1 %v3171_v59  ;;  %2528 = vmatprep.mubr.msk.f32.mxu1 %vm2907_vm1, %v2908_v19 }
0x1350   :  { %2690 = vmatprep.subr.bf16.mxu1 %v2906_v13 }
0x1353   :  { %2692 = vmatpush3.bf16.msra.mxu1 %v3181_v61 }
0x1354   :  { %2699 = vmatprep.subr.bf16.mxu1 %v2906_v13 }
0x1419   :  { %v968_v3 = vpop.f32.mrb[12].mxu1 }
0x141a   :  { %v972_v4 = vadd.f32 %v968_v3, %v182_v2  ;;  %v2488_v5 = vpop.f32.mrb[13].mxu1 }
0x141c   :  { %v2231_v27 = vmul.f32 -1.442695, %v972_v4 }
0x1421   :  { %v1220_v7 = vpop.f32.mrb[14].mxu1 }
0x1422   :  { %v1224_v8 = vadd.f32 %v1220_v7, %v1116_v6  ;;  %v2519_v9 = vpop.f32.mrb[15].mxu1 }
0x1424   :  { %2802 = vtanh.f32 %v1224_v8  ;;  %v2241_v10 = vmul.f32 -1.442695, %v1224_v8 }
0x1426   :  { %2804 = vpow2.f32 %v2241_v10 }
0x142e   :  { %v2803_v18 = vpop.eup %2802 }
0x142f   :  { %1234 = vrot.lane.b32.xlu0 %v2803_v18, %s2909_s16 }
0x1430   :  { %v2805_v24 = vpop.eup %2804 }
0x1431   :  { %v1228_v25 = vadd.f32 1.0, %v2805_v24 }
0x1433   :  { %2806 = vrcp.f32 %v1228_v25 }
0x143d   :  { %v2807_v12 = vpop.eup %2806 }
0x143e   :  { %v1232_v15 = vmul.f32 0.0, %v2807_v12 }
0x14a1   :  { %v1235_v20 = vpop.permute.xlu0 %1234 }
0x14a2   :  { %v1237_v14 = vmul.f32 %v2807_v12, %v1235_v20 }
0x14a4   :  { %1239 = vrot.lane.b32.xlu1 %v1237_v14, %s2910_s3 }
0x1516   :  { %v1240_v16 = vpop.permute.xlu1 %1239 }
0x1517   :  { %v1242_v17 = vadd.f32 %v1240_v16, %v1232_v15 }
0x1519   :  { %2808 = vtanh.f32 %v1242_v17 }
0x151a   :  { %2810 = vtanh.f32 %v972_v4  ;;  %v1126_v4 = vadd.f32 %v3207_v11, %v3153_v45 }
0x151b   :  { %2812 = vpow2.f32 %v2231_v27 }
0x1523   :  { %v2809_v21 = vpop.eup %2808 }
0x1524   :  { %1245 = vrot.lane.b32.xlu0 %v2809_v21, %s2909_s16  ;;  %v2811_v23 = vpop.eup %2810 }
0x1525   :  { %v2813_v28 = vpop.eup %2812 }
0x1526   :  { %v976_v29 = vadd.f32 1.0, %v2813_v28 }
0x1528   :  { %982 = vrot.lane.b32.xlu0 %v2811_v23, %s2909_s16  ;;  %2814 = vrcp.f32 %v976_v29  ;;  %v1131_v23 = vadd.f32 %v3151_v43, %v3207_v11 }
0x1532   :  { %v2815_v32 = vpop.eup %2814 }
0x1533   :  { %v980_v36 = vmul.f32 %v2815_v32, %v3161_v55 }
0x1596   :  { %v1246_v30 = vpop.permute.xlu0 %1245 }
0x1597   :  { %v1248_v31 = vmul.f32 %v2807_v12, %v1246_v30 }
0x1599   :  { %1250 = vrot.lane.b32.xlu1 %v1248_v31, %s2910_s3 }
0x159a   :  { %v983_v33 = vpop.permute.xlu0 %982 }
0x159b   :  { %v985_v34 = vmul.f32 %v2815_v32, %v983_v33 }
0x159d   :  { %987 = vrot.lane.b32.xlu0 %v985_v34, %s2910_s3 }
0x160b   :  { %v1251_v35 = vpop.permute.xlu1 %1250 }
0x160c   :  { %1253 = vst.msk [vmem:[#allocation2] sm:$0xff] %vm55_vm0, %v1251_v35  ;;  %2529 = vmatmul.mubr.msk.f32.vlgmr.msra.gmra.mrb[16].mxu1 %vm55_vm0, %v1251_v35 }
0x160d   :  { %2701 = vmatpush3.bf16.msra.mxu1 %v3171_v59  ;;  %2550 = vmatprep.mubr.msk.f32.mxu1 %vm2907_vm1, %v2908_v19 }
0x160e   :  { %2702 = vmatprep.subr.bf16.mxu1 %v2906_v13 }
0x160f   :  { %v988_v37 = vpop.permute.xlu0 %987 }
0x1610   :  { %v990_v38 = vadd.f32 %v988_v37, %v980_v36 }
0x1611   :  { %2704 = vmatpush3.bf16.msra.mxu1 %v3181_v61 }
0x1612   :  { %2816 = vtanh.f32 %v990_v38  ;;  %2711 = vmatprep.subr.bf16.mxu1 %v2906_v13 }
0x161c   :  { %v2817_v39 = vpop.eup %2816 }
0x161d   :  { %993 = vrot.lane.b32.xlu0 %v2817_v39, %s2909_s16 }
0x168f   :  { %v994_v40 = vpop.permute.xlu0 %993 }
0x1690   :  { %v996_v42 = vmul.f32 %v2815_v32, %v994_v40 }
0x1692   :  { %998 = vrot.lane.b32.xlu0 %v996_v42, %s2910_s3 }
0x16df   :  { %v1322_v48 = vpop.f32.mrb[16].mxu1 }
0x16e0   :  { %v1326_v26 = vadd.f32 %v1322_v48, %v1121_v44  ;;  %v2530_v49 = vpop.f32.mrb[17].mxu1  ;;  %v1136_v48 = vadd.f32 %v3207_v11, %v3158_v47 }
0x16e2   :  { %2818 = vtanh.f32 %v1326_v26  ;;  %v2243_v53 = vmul.f32 -1.442695, %v1326_v26 }
0x16e4   :  { %2820 = vpow2.f32 %v2243_v53 }
0x16ec   :  { %v2819_v50 = vpop.eup %2818 }
0x16ed   :  { %1336 = vrot.lane.b32.xlu1 %v2819_v50, %s2909_s16 }
0x16ee   :  { %v2821_v54 = vpop.eup %2820 }
0x16ef   :  { %v1330_v41 = vadd.f32 1.0, %v2821_v54 }
0x16f1   :  { %2822 = vrcp.f32 %v1330_v41 }
0x16fb   :  { %v2823_v55 = vpop.eup %2822 }
0x16fc   :  { %v1334_v58 = vmul.f32 %v2823_v55, %v1242_v17 }
0x1704   :  { %v999_v51 = vpop.permute.xlu0 %998 }
0x1705   :  { %1001 = vst.msk [vmem:[#allocation2 + $0x38] sm:$0xff] %vm55_vm0, %v999_v51 }
0x170c   :  { %v1009_v52 = vld [vmem:[#allocation2 + $0x38] sm:$0xff] }
0x170d   :  { %2507 = vmatmul.mubr.msk.f32.gmra.mrb[16].mxu0 %vm55_vm0, %v1009_v52 }
0x170e   :  { %2539 = vmatprep.mubr.msk.f32.mxu0 %vm2907_vm1, %v2908_v19 }
0x175f   :  { %v1337_v56 = vpop.permute.xlu1 %1336 }
0x1760   :  { %v1339_v57 = vmul.f32 %v2823_v55, %v1337_v56 }
0x1762   :  { %1341 = vrot.lane.b32.xlu1 %v1339_v57, %s2910_s3 }
0x17d4   :  { %v1342_v60 = vpop.permute.xlu1 %1341 }
0x17d5   :  { %v1344_v22 = vadd.f32 %v1342_v60, %v1334_v58 }
0x17d7   :  { %2824 = vtanh.f32 %v1344_v22 }
0x17e0   :  { %v3235_v62 = vpop.f32.mrb[16].mxu0 }
0x17e1   :  { %v2825_v63 = vpop.eup %2824  ;;  %v3237_v0 = vpop.f32.mrb[17].mxu0 }
0x17e2   :  { %1347 = vrot.lane.b32.xlu1 %v2825_v63, %s2909_s16 }
0x1854   :  { %v1348_v1 = vpop.permute.xlu1 %1347 }
0x1855   :  { %v1350_v2 = vmul.f32 %v2823_v55, %v1348_v1 }
0x1857   :  { %1352 = vrot.lane.b32.xlu1 %v1350_v2, %s2910_s3  ;;  %v1141_v2 = vadd.f32 %v3156_v46, %v3207_v11 }
0x18c9   :  { %v1353_v3 = vpop.permute.xlu1 %1352 }
0x18ca   :  { %1355 = vst.msk [vmem:[#allocation2 + $0x8] sm:$0xff] %vm55_vm0, %v1353_v3  ;;  %2540 = vmatmul.mubr.msk.f32.vlgmr.msra.gmra.mrb[18].mxu0 %vm55_vm0, %v1353_v3 }
0x18cb   :  { %2707 = vmatpush3.bf16.msra.mxu0 %v3171_v59  ;;  %2561 = vmatprep.mubr.msk.f32.mxu0 %vm2907_vm1, %v2908_v19 }
0x18cc   :  { %2708 = vmatprep.subr.bf16.mxu0 %v2906_v13 }
0x18cf   :  { %2710 = vmatpush3.bf16.msra.mxu0 %v3181_v61 }
0x18d0   :  { %2717 = vmatprep.subr.bf16.mxu0 %v2906_v13 }
0x199d   :  { %v1424_v5 = vpop.f32.mrb[18].mxu0 }
0x199e   :  { %v1428_v6 = vadd.f32 %v1424_v5, %v1126_v4  ;;  %v2541_v7 = vpop.f32.mrb[19].mxu0 }
0x19a0   :  { %2826 = vtanh.f32 %v1428_v6  ;;  %v2245_v9 = vmul.f32 -1.442695, %v1428_v6 }
0x19a2   :  { %2828 = vpow2.f32 %v2245_v9 }
0x19aa   :  { %v2827_v8 = vpop.eup %2826 }
0x19ab   :  { %1438 = vrot.lane.b32.xlu0 %v2827_v8, %s2909_s16 }
0x19ac   :  { %v2829_v18 = vpop.eup %2828 }
0x19ad   :  { %v1432_v10 = vadd.f32 1.0, %v2829_v18 }
0x19af   :  { %2830 = vrcp.f32 %v1432_v10  ;;  %v1976_v10 = vld [vmem:[%s3393_s7] sm:$0xff] }
0x19b9   :  { %v2831_v24 = vpop.eup %2830 }
0x19ba   :  { %v1436_v20 = vmul.f32 %v2831_v24, %v1344_v22 }
0x1a1d   :  { %v1439_v25 = vpop.permute.xlu0 %1438 }
0x1a1e   :  { %v1441_v12 = vmul.f32 %v2831_v24, %v1439_v25 }
0x1a20   :  { %1443 = vrot.lane.b32.xlu1 %v1441_v12, %s2910_s3 }
0x1a92   :  { %v1444_v14 = vpop.permute.xlu1 %1443 }
0x1a93   :  { %v1446_v45 = vadd.f32 %v1444_v14, %v1436_v20 }
0x1a95   :  { %2832 = vtanh.f32 %v1446_v45 }
0x1a9f   :  { %v2833_v15 = vpop.eup %2832 }
0x1aa0   :  { %1449 = vrot.lane.b32.xlu0 %v2833_v15, %s2909_s16  ;;  %v1979_v15 = vld [vmem:[%s3393_s7 + $0x18] sm:$0xff] }
0x1b12   :  { %v1450_v16 = vpop.permute.xlu0 %1449 }
0x1b13   :  { %v1452_v17 = vmul.f32 %v2831_v24, %v1450_v16  ;;  %v1977_v24 = vld [vmem:[%s3393_s7 + $0x8] sm:$0xff] }
0x1b14   :  { %v2729_v25 = vpack.c.bf16 %v1977_v24, %v1976_v10 }
0x1b15   :  { %1454 = vrot.lane.b32.xlu1 %v1452_v17, %s2910_s3 }
0x1b87   :  { %v1455_v21 = vpop.permute.xlu1 %1454 }
0x1b88   :  { %1457 = vst.msk [vmem:[#allocation2 + $0x10] sm:$0xff] %vm55_vm0, %v1455_v21  ;;  %2551 = vmatmul.mubr.msk.f32.vlgmr.msra.gmra.mrb[18].mxu1 %vm55_vm0, %v1455_v21  ;;  %v1968_v21 = vld [vmem:[#allocation2] sm:$0xff] }
0x1b89   :  { %2713 = vmatpush3.bf16.msra.mxu1 %v3171_v59  ;;  %2572 = vmatprep.mubr.msk.f32.mxu1 %vm2907_vm1, %v2908_v19 }
0x1b8a   :  { %2714 = vmatprep.subr.bf16.mxu1 %v2906_v13 }
0x1b8d   :  { %2716 = vmatpush3.bf16.msra.mxu1 %v3181_v61 }
0x1b8e   :  { %2723 = vmatprep.subr.bf16.mxu1 %v2906_v13 }
0x1c5b   :  { %v1526_v27 = vpop.f32.mrb[18].mxu1 }
0x1c5c   :  { %v1530_v28 = vadd.f32 %v1526_v27, %v1131_v23  ;;  %v2552_v29 = vpop.f32.mrb[19].mxu1  ;;  %v1969_v23 = vld [vmem:[#allocation2 + $0x8] sm:$0xff]  ;;  %v1970_v27 = vld [vmem:[#allocation2 + $0x10] sm:$0xff] }
0x1c5e   :  { %2834 = vtanh.f32 %v1530_v28  ;;  %v2247_v31 = vmul.f32 -1.442695, %v1530_v28 }
0x1c60   :  { %2836 = vpow2.f32 %v2247_v31  ;;  %v1146_v31 = vadd.f32 %v3207_v11, %v3237_v0 }
0x1c68   :  { %v2835_v30 = vpop.eup %2834 }
0x1c69   :  { %1540 = vrot.lane.b32.xlu0 %v2835_v30, %s2909_s16 }
0x1c6a   :  { %v2837_v32 = vpop.eup %2836 }
0x1c6b   :  { %v1534_v33 = vadd.f32 1.0, %v2837_v32 }
0x1c6d   :  { %2838 = vrcp.f32 %v1534_v33 }
0x1c77   :  { %v2839_v34 = vpop.eup %2838 }
0x1c78   :  { %v1538_v37 = vmul.f32 %v2839_v34, %v1446_v45  ;;  %v1978_v45 = vld [vmem:[%s3393_s7 + $0x10] sm:$0xff] }
0x1c79   :  { %v2733_v16 = vpack.c.bf16 %v1979_v15, %v1978_v45 }
0x1cdb   :  { %v1541_v35 = vpop.permute.xlu0 %1540 }
0x1cdc   :  { %v1543_v36 = vmul.f32 %v2839_v34, %v1541_v35 }
0x1cde   :  { %1545 = vrot.lane.b32.xlu1 %v1543_v36, %s2910_s3 }
0x1d50   :  { %v1546_v38 = vpop.permute.xlu1 %1545 }
0x1d51   :  { %v1548_v43 = vadd.f32 %v1546_v38, %v1538_v37 }
0x1d53   :  { %2840 = vtanh.f32 %v1548_v43 }
0x1d5d   :  { %v2841_v39 = vpop.eup %2840 }
0x1d5e   :  { %1551 = vrot.lane.b32.xlu0 %v2841_v39, %s2909_s16 }
0x1dd0   :  { %v1552_v40 = vpop.permute.xlu0 %1551 }
0x1dd1   :  { %v1554_v42 = vmul.f32 %v2839_v34, %v1552_v40 }
0x1dd3   :  { %1556 = vrot.lane.b32.xlu1 %v1554_v42, %s2910_s3 }
0x1e45   :  { %v1557_v44 = vpop.permute.xlu1 %1556 }
0x1e46   :  { %1559 = vst.msk [vmem:[#allocation2 + $0x18] sm:$0xff] %vm55_vm0, %v1557_v44  ;;  %2562 = vmatmul.mubr.msk.f32.vlgmr.msra.gmra.mrb[20].mxu0 %vm55_vm0, %v1557_v44 }
0x1e47   :  { %2719 = vmatpush3.bf16.msra.mxu0 %v3171_v59  ;;  %2583 = vmatprep.mubr.msk.f32.mxu0 %vm2907_vm1, %v2908_v19 }
0x1e48   :  { %2720 = vmatprep.subr.bf16.mxu0 %v2906_v13 }
0x1e4b   :  { %2722 = vmatpush3.bf16.msra.mxu0 %v3181_v61 }
0x1e4c   :  { %2730 = vmatprep.subr.bf16.mxu0 %v2729_v25 }
0x1e4d   :  { %v1971_v28 = vld [vmem:[#allocation2 + $0x18] sm:$0xff] }
0x1f19   :  { %v1628_v26 = vpop.f32.mrb[20].mxu0 }
0x1f1a   :  { %v1632_v49 = vadd.f32 %v1628_v26, %v1136_v48  ;;  %v2563_v50 = vpop.f32.mrb[21].mxu0 }
0x1f1c   :  { %2842 = vtanh.f32 %v1632_v49  ;;  %v2249_v52 = vmul.f32 -1.442695, %v1632_v49 }
0x1f1e   :  { %2844 = vpow2.f32 %v2249_v52 }
0x1f26   :  { %v2843_v51 = vpop.eup %2842 }
0x1f27   :  { %1642 = vrot.lane.b32.xlu0 %v2843_v51, %s2909_s16 }
0x1f28   :  { %v2845_v53 = vpop.eup %2844 }
0x1f29   :  { %v1636_v54 = vadd.f32 1.0, %v2845_v53 }
0x1f2b   :  { %2846 = vrcp.f32 %v1636_v54 }
0x1f35   :  { %v2847_v41 = vpop.eup %2846 }
0x1f36   :  { %v1640_v57 = vmul.f32 %v2847_v41, %v1548_v43 }
0x1f99   :  { %v1643_v55 = vpop.permute.xlu0 %1642 }
0x1f9a   :  { %v1645_v56 = vmul.f32 %v2847_v41, %v1643_v55 }
0x1f9c   :  { %1647 = vrot.lane.b32.xlu1 %v1645_v56, %s2910_s3 }
0x200e   :  { %v1648_v58 = vpop.permute.xlu1 %1647 }
0x200f   :  { %v1650_v47 = vadd.f32 %v1648_v58, %v1640_v57  ;;  %v1151_v57 = vadd.f32 %v3235_v62, %v3207_v11 }
0x2011   :  { %2848 = vtanh.f32 %v1650_v47 }
0x201b   :  { %v2849_v60 = vpop.eup %2848 }
0x201c   :  { %1653 = vrot.lane.b32.xlu0 %v2849_v60, %s2909_s16 }
0x208e   :  { %v1654_v22 = vpop.permute.xlu0 %1653 }
0x208f   :  { %v1656_v63 = vmul.f32 %v2847_v41, %v1654_v22 }
0x2091   :  { %1658 = vrot.lane.b32.xlu1 %v1656_v63, %s2910_s3 }
0x2103   :  { %v1659_v1 = vpop.permute.xlu1 %1658 }
0x2104   :  { %1661 = vst.msk [vmem:[#allocation2 + $0x20] sm:$0xff] %vm55_vm0, %v1659_v1  ;;  %2573 = vmatmul.mubr.msk.f32.vlgmr.msra.gmra.mrb[20].mxu1 %vm55_vm0, %v1659_v1 }
0x2105   :  { %2725 = vmatpush3.bf16.msra.mxu1 %v3171_v59  ;;  %2594 = vmatprep.mubr.msk.f32.mxu1 %vm2907_vm1, %v2908_v19 }
0x2106   :  { %2726 = vmatprep.subr.bf16.mxu1 %v2906_v13 }
0x2109   :  { %2728 = vmatpush3.bf16.msra.mxu1 %v3181_v61 }
0x210b   :  { %v1972_v29 = vld [vmem:[#allocation2 + $0x20] sm:$0xff] }
0x21d7   :  { %v1730_v3 = vpop.f32.mrb[20].mxu1 }
0x21d8   :  { %v1734_v4 = vadd.f32 %v1730_v3, %v1141_v2  ;;  %v2574_v5 = vpop.f32.mrb[21].mxu1 }
0x21da   :  { %2850 = vtanh.f32 %v1734_v4  ;;  %v2251_v7 = vmul.f32 -1.442695, %v1734_v4 }
0x21dc   :  { %2852 = vpow2.f32 %v2251_v7 }
0x21e4   :  { %v2851_v6 = vpop.eup %2850 }
0x21e5   :  { %1744 = vrot.lane.b32.xlu0 %v2851_v6, %s2909_s16 }
0x21e6   :  { %v2853_v59 = vpop.eup %2852 }
0x21e7   :  { %v1738_v8 = vadd.f32 1.0, %v2853_v59  ;;  %v2256_v59 = vld [vmem:[%s3394_s8] ss:$0 sm:$0xff] }
0x21e9   :  { %2854 = vrcp.f32 %v1738_v8 }
0x21f3   :  { %v2855_v19 = vpop.eup %2854 }
0x21f4   :  { %v1742_v61 = vmul.f32 %v2855_v19, %v1650_v47 }
0x2257   :  { %v1745_v9 = vpop.permute.xlu0 %1744 }
0x2258   :  { %v1747_v13 = vmul.f32 %v2855_v19, %v1745_v9 }
0x225a   :  { %1749 = vrot.lane.b32.xlu1 %v1747_v13, %s2910_s3 }
0x22cc   :  { %v1750_v18 = vpop.permute.xlu1 %1749 }
0x22cd   :  { %v1752_v46 = vadd.f32 %v1750_v18, %v1742_v61 }
0x22cf   :  { %2856 = vtanh.f32 %v1752_v46 }
0x22d9   :  { %v2857_v12 = vpop.eup %2856 }
0x22da   :  { %1755 = vrot.lane.b32.xlu0 %v2857_v12, %s2909_s16 }
0x234c   :  { %v1756_v20 = vpop.permute.xlu0 %1755 }
0x234d   :  { %v1758_v14 = vmul.f32 %v2855_v19, %v1756_v20 }
0x234f   :  { %1760 = vrot.lane.b32.xlu1 %v1758_v14, %s2910_s3 }
0x23c1   :  { %v1761_v17 = vpop.permute.xlu1 %1760 }
0x23c2   :  { %1763 = vst.msk [vmem:[#allocation2 + $0x28] sm:$0xff] %vm55_vm0, %v1761_v17  ;;  %2584 = vmatmul.mubr.msk.f32.vlgmr.msra.gmra.mrb[22].mxu0 %vm55_vm0, %v1761_v17 }
0x23c3   :  { %2732 = vmatpush3.bf16.msra.mxu0 %v2729_v25  ;;  %2605 = vmatprep.mubr.msk.f32.mxu0 %vm55_vm0, %v1968_v21 }
0x23c4   :  { %2734 = vmatprep.subr.bf16.mxu0 %v2733_v16 }
0x23c7   :  { %2736 = vmatpush3.bf16.msra.mxu0 %v2733_v16 }
0x23c9   :  { %v1973_v30 = vld [vmem:[#allocation2 + $0x28] sm:$0xff] }
0x23ca   :  { %2606 = vmatmul.mubr.msk.f32.vlgmr.msra.gmra.mrb[24].mxu0 %vm55_vm0, %v1969_v23 }
0x23cb   :  { %2608 = vmatprep.mubr.msk.f32.mxu0 %vm55_vm0, %v1970_v27 }
0x23ce   :  { %2609 = vmatmul.mubr.msk.f32.gmra.mrb[26].mxu0 %vm55_vm0, %v1971_v28 }
0x23cf   :  { %2611 = vmatprep.mubr.msk.f32.mxu0 %vm55_vm0, %v1972_v29 }
0x23d2   :  { %2612 = vmatmul.mubr.msk.f32.gmra.mrb[28].mxu0 %vm55_vm0, %v1973_v30 }
0x2495   :  { %v1832_v32 = vpop.f32.mrb[22].mxu0 }
0x2496   :  { %v1836_v33 = vadd.f32 %v1832_v32, %v1146_v31  ;;  %v2585_v34 = vpop.f32.mrb[23].mxu0 }
0x2498   :  { %2858 = vtanh.f32 %v1836_v33  ;;  %v2253_v42 = vmul.f32 -1.442695, %v1836_v33 }
0x249a   :  { %2860 = vpow2.f32 %v2253_v42 }
0x249d   :  { %v3317_v35 = vpop.f32.mrb[24].mxu0 }
0x249e   :  { %v2077_v36 = vpop.f32.mrb[25].mxu0 }
0x249f   :  { %v2078_v8 = vadd.f32 %v2256_v59, %v2077_v36 }
0x24a1   :  { %v2610_v37 = vpop.f32.mrb[26].mxu0 }
0x24a2   :  { %v2859_v38 = vpop.eup %2858  ;;  %v2087_v43 = vpop.f32.mrb[27].mxu0  ;;  %v2093_v9 = vadd.f32 %v2610_v37, %v2256_v59 }
0x24a3   :  { %1846 = vrot.lane.b32.xlu0 %v2859_v38, %s2909_s16  ;;  %v2088_v19 = vadd.f32 %v2256_v59, %v2087_v43 }
0x24a4   :  { %v2861_v44 = vpop.eup %2860 }
0x24a5   :  { %v2613_v39 = vpop.f32.mrb[28].mxu0  ;;  %v1840_v48 = vadd.f32 1.0, %v2861_v44 }
0x24a6   :  { %v2097_v40 = vpop.f32.mrb[29].mxu0  ;;  %v2103_v13 = vadd.f32 %v2613_v39, %v2256_v59 }
0x24a7   :  { %2862 = vrcp.f32 %v1840_v48  ;;  %v2098_v10 = vadd.f32 %v2256_v59, %v2097_v40 }
0x24b1   :  { %v2863_v0 = vpop.eup %2862 }
0x24b2   :  { %v1844_v50 = vmul.f32 %v2863_v0, %v1752_v46  ;;  %v2083_v46 = vadd.f32 %v3317_v35, %v2256_v59 }
0x2515   :  { %v1847_v26 = vpop.permute.xlu0 %1846 }
0x2516   :  { %v1849_v49 = vmul.f32 %v2863_v0, %v1847_v26 }
0x2518   :  { %1851 = vrot.lane.b32.xlu1 %v1849_v49, %s2910_s3 }
0x258a   :  { %v1852_v51 = vpop.permute.xlu1 %1851 }
0x258b   :  { %v1854_v52 = vadd.f32 %v1852_v51, %v1844_v50 }
0x258d   :  { %2864 = vtanh.f32 %v1854_v52 }
0x2597   :  { %v2865_v53 = vpop.eup %2864 }
0x2598   :  { %1857 = vrot.lane.b32.xlu0 %v2865_v53, %s2909_s16 }
0x260a   :  { %v1858_v54 = vpop.permute.xlu0 %1857 }
0x260b   :  { %v1860_v41 = vmul.f32 %v2863_v0, %v1858_v54 }
0x260d   :  { %1862 = vrot.lane.b32.xlu1 %v1860_v41, %s2910_s3 }
0x267f   :  { %v1863_v55 = vpop.permute.xlu1 %1862 }
0x2680   :  { %1865 = vst.msk [vmem:[#allocation2 + $0x30] sm:$0xff] %vm55_vm0, %v1863_v55  ;;  %2595 = vmatmul.mubr.msk.f32.vlgmr.msra.gmra.mrb[22].mxu1 %vm55_vm0, %v1863_v55 }
0x2687   :  { %v1974_v56 = vld [vmem:[#allocation2 + $0x30] sm:$0xff] }
0x2688   :  { %2614 = vmatprep.mubr.msk.f32.mxu0 %vm55_vm0, %v1974_v56 }
0x2753   :  { %v1934_v58 = vpop.f32.mrb[22].mxu1 }
0x2754   :  { %v1938_v47 = vadd.f32 %v1934_v58, %v1151_v57  ;;  %v2596_v60 = vpop.f32.mrb[23].mxu1 }
0x2756   :  { %2866 = vtanh.f32 %v1938_v47  ;;  %v2255_v63 = vmul.f32 -1.442695, %v1938_v47 }
0x2758   :  { %2868 = vpow2.f32 %v2255_v63 }
0x2760   :  { %v2867_v22 = vpop.eup %2866 }
0x2761   :  { %1948 = vrot.lane.b32.xlu0 %v2867_v22, %s2909_s16 }
0x2762   :  { %v2869_v1 = vpop.eup %2868 }
0x2763   :  { %v1942_v2 = vadd.f32 1.0, %v2869_v1 }
0x2765   :  { %2870 = vrcp.f32 %v1942_v2 }
0x276f   :  { %v2871_v3 = vpop.eup %2870 }
0x2770   :  { %v1946_v6 = vmul.f32 %v2871_v3, %v1854_v52 }
0x27d3   :  { %v1949_v4 = vpop.permute.xlu0 %1948 }
0x27d4   :  { %v1951_v5 = vmul.f32 %v2871_v3, %v1949_v4 }
0x27d6   :  { %1953 = vrot.lane.b32.xlu1 %v1951_v5, %s2910_s3 }
0x2848   :  { %v1954_v7 = vpop.permute.xlu1 %1953 }
0x2849   :  { %v1956_v11 = vadd.f32 %v1954_v7, %v1946_v6 }
0x284b   :  { %2872 = vtanh.f32 %v1956_v11 }
0x2855   :  { %v2873_v62 = vpop.eup %2872 }
0x2856   :  { %1959 = vrot.lane.b32.xlu0 %v2873_v62, %s2909_s16 }
0x2875   :  { %2116 = vmax.xlane.f32.xlu0 %v2078_v8 }
0x2879   :  { %2120 = vmax.xlane.f32.xlu0 %v2088_v19 }
0x287d   :  { %2122 = vmax.xlane.f32.xlu0 %v2093_v9 }
0x2881   :  { %2126 = vmax.xlane.f32.xlu0 %v2103_v13 }
0x28c8   :  { %v1960_v61 = vpop.permute.xlu0 %1959 }
0x28c9   :  { %v1962_v18 = vmul.f32 %v2871_v3, %v1960_v61 }
0x28cb   :  { %1964 = vrot.lane.b32.xlu1 %v1962_v18, %s2910_s3 }
0x28ef   :  { %2118 = vmax.xlane.f32.xlu1 %v2083_v46 }
0x28f3   :  { %2124 = vmax.xlane.f32.xlu1 %v2098_v10 }
0x2902   :  { %v2117_v12 = vpop.xlane.xlu0 %2116 }
0x2903   :  { %v3340_v16 = vsub.f32 %v2078_v8, %v2117_v12 }
0x2905   :  { %v2140_v23 = vmul.f32 1.442695, %v3340_v16 }
0x2906   :  { %v2121_v20 = vpop.xlane.xlu0 %2120 }
0x2907   :  { %v3346_v27 = vsub.f32 %v2088_v19, %v2121_v20 }
0x2909   :  { %v2144_v32 = vmul.f32 1.442695, %v3346_v27 }
0x290a   :  { %v2123_v45 = vpop.xlane.xlu0 %2122 }
0x290b   :  { %v3342_v17 = vsub.f32 %v2093_v9, %v2123_v45 }
0x290d   :  { %v2146_v30 = vmul.f32 1.442695, %v3342_v17 }
0x290e   :  { %v2127_v28 = vpop.xlane.xlu0 %2126 }
0x290f   :  { %v3349_v31 = vsub.f32 %v2103_v13, %v2127_v28 }
0x2911   :  { %v2150_v34 = vmul.f32 1.442695, %v3349_v31 }
0x293d   :  { %v1965_v24 = vpop.permute.xlu1 %1964 }
0x293e   :  { %1967 = vst.msk [vmem:[#allocation2 + $0x38] sm:$0xff] %vm55_vm0, %v1965_v24 }
0x2945   :  { %v1975_v25 = vld [vmem:[#allocation2 + $0x38] sm:$0xff] }
0x2946   :  { %2615 = vmatmul.mubr.msk.f32.gmra.mrb[30].mxu0 %vm55_vm0, %v1975_v25 }
0x297c   :  { %v2119_v14 = vpop.xlane.xlu1 %2118 }
0x297d   :  { %v3338_v15 = vsub.f32 %v2083_v46, %v2119_v14 }
0x297f   :  { %v2142_v21 = vmul.f32 1.442695, %v3338_v15 }
0x2980   :  { %v2125_v29 = vpop.xlane.xlu1 %2124 }
0x2981   :  { %2874 = vpow2.f32 %v2142_v21  ;;  %v3352_v33 = vsub.f32 %v2098_v10, %v2125_v29 }
0x2982   :  { %2876 = vpow2.f32 %v2140_v23 }
0x2983   :  { %2878 = vpow2.f32 %v2146_v30  ;;  %v2148_v36 = vmul.f32 1.442695, %v3352_v33 }
0x2984   :  { %2880 = vpow2.f32 %v2144_v32 }
0x2985   :  { %2882 = vpow2.f32 %v2150_v34 }
0x2986   :  { %2884 = vpow2.f32 %v2148_v36 }
0x298b   :  { %v2875_v39 = vpop.eup %2874 }
0x298c   :  { %v2877_v40 = vpop.eup %2876 }
0x298d   :  { %v2879_v42 = vpop.eup %2878 }
0x298e   :  { %v2881_v44 = vpop.eup %2880 }
0x298f   :  { %v2883_v48 = vpop.eup %2882 }
0x2990   :  { %v2885_v0 = vpop.eup %2884 }
0x2a19   :  { %v2616_v35 = vpop.f32.mrb[30].mxu0 }
0x2a1a   :  { %v2113_v37 = vadd.f32 %v2616_v35, %v2256_v59  ;;  %v2107_v38 = vpop.f32.mrb[31].mxu0 }
0x2a1b   :  { %v2108_v43 = vadd.f32 %v2256_v59, %v2107_v38 }
0x2a1c   :  { %2130 = vmax.xlane.f32.xlu0 %v2113_v37 }
0x2a1d   :  { %2128 = vmax.xlane.f32.xlu1 %v2108_v43 }
0x2a20   :  { %2158 = vadd.xlane.f32.xlu0 %v2875_v39 }
0x2a21   :  { %2156 = vadd.xlane.f32.xlu1 %v2877_v40 }
0x2a24   :  { %2162 = vadd.xlane.f32.xlu0 %v2879_v42 }
0x2a25   :  { %2160 = vadd.xlane.f32.xlu1 %v2881_v44 }
0x2a28   :  { %2166 = vadd.xlane.f32.xlu0 %v2883_v48 }
0x2a29   :  { %2164 = vadd.xlane.f32.xlu1 %v2885_v0 }
0x2aa9   :  { %v2131_v26 = vpop.xlane.xlu0 %2130 }
0x2aaa   :  { %v2139_v49 = vsub.f32 %v2113_v37, %v2131_v26  ;;  %v2129_v50 = vpop.xlane.xlu1 %2128 }
0x2aab   :  { %v2138_v51 = vsub.f32 %v2108_v43, %v2129_v50 }
0x2aac   :  { %v2154_v52 = vmul.f32 1.442695, %v2139_v49 }
0x2aad   :  { %v2152_v53 = vmul.f32 1.442695, %v2138_v51  ;;  %v2159_v54 = vpop.xlane.xlu0 %2158 }
0x2aae   :  { %2886 = vpow2.f32 %v2154_v52  ;;  %v2157_v41 = vpop.xlane.xlu1 %2156 }
0x2aaf   :  { %2888 = vpow2.f32 %v2152_v53 }
0x2ab0   :  { %2890 = vlog2.f32 %v2159_v54 }
0x2ab1   :  { %2892 = vlog2.f32 %v2157_v41  ;;  %v2163_v55 = vpop.xlane.xlu0 %2162 }
0x2ab2   :  { %2894 = vlog2.f32 %v2163_v55  ;;  %v2161_v56 = vpop.xlane.xlu1 %2160 }
0x2ab3   :  { %2896 = vlog2.f32 %v2161_v56 }
0x2ab5   :  { %v2167_v57 = vpop.xlane.xlu0 %2166 }
0x2ab6   :  { %2898 = vlog2.f32 %v2167_v57  ;;  %v2165_v58 = vpop.xlane.xlu1 %2164 }
0x2ab7   :  { %2900 = vlog2.f32 %v2165_v58 }
0x2ab8   :  { %v2887_v47 = vpop.eup %2886 }
0x2ab9   :  { %v2889_v60 = vpop.eup %2888  ;;  %2170 = vadd.xlane.f32.xlu0 %v2887_v47 }
0x2aba   :  { %v2891_v22 = vpop.eup %2890  ;;  %2168 = vadd.xlane.f32.xlu1 %v2889_v60 }
0x2abb   :  { %v2893_v63 = vpop.eup %2892  ;;  %v2175_v1 = vmul.f32 0.6931472, %v2891_v22 }
0x2abc   :  { %v2895_v2 = vpop.eup %2894  ;;  %v2173_v3 = vmul.f32 0.6931472, %v2893_v63 }
0x2abd   :  { %v2897_v4 = vpop.eup %2896  ;;  %v2189_v5 = vsub.f32 %v3338_v15, %v2175_v1  ;;  %v2179_v6 = vmul.f32 0.6931472, %v2895_v2 }
0x2abe   :  { %v2188_v7 = vsub.f32 %v3340_v16, %v2173_v3  ;;  %v2177_v11 = vmul.f32 0.6931472, %v2897_v4 }
0x2abf   :  { %2197 = vst [vmem:[%s3395_s9 + $0x8] sm:$0xff] %v2189_v5  ;;  %v2191_v62 = vsub.f32 %v3342_v17, %v2179_v6 }
0x2ac0   :  { %v2899_v59 = vpop.eup %2898  ;;  %2196 = vst [vmem:[%s3395_s9] sm:$0xff] %v2188_v7  ;;  %v2190_v8 = vsub.f32 %v3346_v27, %v2177_v11 }
0x2ac1   :  { %v2901_v19 = vpop.eup %2900  ;;  %2199 = vst [vmem:[%s3395_s9 + $0x18] sm:$0xff] %v2191_v62  ;;  %v2183_v9 = vmul.f32 0.6931472, %v2899_v59 }
0x2ac2   :  { %2198 = vst [vmem:[%s3395_s9 + $0x10] sm:$0xff] %v2190_v8  ;;  %v2181_v13 = vmul.f32 0.6931472, %v2901_v19 }
0x2ac3   :  { %v2193_v61 = vsub.f32 %v3349_v31, %v2183_v9 }
0x2ac4   :  { %v2192_v18 = vsub.f32 %v3352_v33, %v2181_v13 }
0x2ac5   :  { %2201 = vst [vmem:[%s3395_s9 + $0x28] sm:$0xff] %v2193_v61 }
0x2ac6   :  { %2200 = vst [vmem:[%s3395_s9 + $0x20] sm:$0xff] %v2192_v18 }
0x2b46   :  { %v2171_v46 = vpop.xlane.xlu0 %2170 }
0x2b47   :  { %2902 = vlog2.f32 %v2171_v46  ;;  %v2169_v10 = vpop.xlane.xlu1 %2168 }
0x2b48   :  { %2904 = vlog2.f32 %v2169_v10 }
0x2b51   :  { %v2903_v24 = vpop.eup %2902 }
0x2b52   :  { %v2905_v25 = vpop.eup %2904  ;;  %v2187_v12 = vmul.f32 0.6931472, %v2903_v24 }
0x2b53   :  { %v2185_v20 = vmul.f32 0.6931472, %v2905_v25 }
0x2b54   :  { %v2195_v14 = vsub.f32 %v2139_v49, %v2187_v12 }
0x2b55   :  { %v2194_v45 = vsub.f32 %v2138_v51, %v2185_v20 }
0x2b56   :  { %2203 = vst [vmem:[%s3395_s9 + $0x38] sm:$0xff] %v2195_v14 }
0x2b57   :  { %2202 = vst [vmem:[%s3395_s9 + $0x30] sm:$0xff] %v2194_v45 }

</bundles_post_ra>
